<compile_context>
chip_gen: v6e
topology: v6e:2x2x1
jax: 0.10.0
libtpu: 0.0.40
codegen_flags: <defaults>
</compile_context>

<pallas_src>
import functools

import jax
import jax.numpy as jnp
from jax.experimental import pallas as pl
from jax.experimental.pallas import tpu as pltpu


def _lstm_linear_kernel(x_ref, w_ih_ref, w_hh_ref, b_ref, q_ref,
                        w_h_ref, w_q_ref, b_out_ref, out_ref,
                        h_ref, c_ref, *,
                        t_total, t_chunk, double, unroll, matmul_dtype):
    """One (batch-block, time-chunk) grid step of the fused LSTM + linear head.

    x_ref      : (t_chunk, Bb, I)   time-major input chunk (streamed, double-buffered)
    w_ih_ref   : (4, I, H)          gate-major input weights  (resident)
    w_hh_ref   : (4, H, H)          gate-major recurrent weights (resident)
    b_ref      : (4, 1, H)          gate-major bias (b_ih + b_hh pre-summed)
    q_ref      : (Bb, 1)            quantile
    w_h_ref    : (H, P), w_q_ref: (1, P), b_out_ref: (1, P)   linear head
    out_ref    : (Bb, P) or (Bb, 2P)
    h_ref/c_ref: (Bb, H)            recurrent state carried across time chunks
    """
    H = w_hh_ref.shape[1]
    P = w_h_ref.shape[1]

    chunk = pl.program_id(1)
    n_chunks = pl.num_programs(1)

    @pl.when(chunk == 0)
    def _():
        h_ref[...] = jnp.zeros_like(h_ref)
        c_ref[...] = jnp.zeros_like(c_ref)

    # Hoist weight loads out of the serial time loop (optionally cast to bf16
    # so the MXU runs at native precision on v6e/v7x; elementwise math stays f32).
    w_ih = [w_ih_ref[k].astype(matmul_dtype) for k in range(4)]
    w_hh = [w_hh_ref[k].astype(matmul_dtype) for k in range(4)]
    bias = [b_ref[k] for k in range(4)]          # each (1, H)

    def step(t, carry):
        h, c = carry
        xt = x_ref[t].astype(matmul_dtype)       # (Bb, I), leading-dim index: free view
        hm = h.astype(matmul_dtype)
        # Gate-major: each gate pre-activation is its own (Bb, H) tile at lane
        # offset 0 -> no cross-lane slicing on the serial critical path.  The
        # x@W_ih matmuls do not depend on h and hide under the recurrent matmul.
        pre = [jnp.dot(xt, w_ih[k], preferred_element_type=jnp.float32)
               + jnp.dot(hm, w_hh[k], preferred_element_type=jnp.float32)
               + bias[k]
               for k in range(4)]
        i_g = jax.nn.sigmoid(pre[0])
        f_g = jax.nn.sigmoid(pre[1])
        g_g = jnp.tanh(pre[2])
        o_g = jax.nn.sigmoid(pre[3])
        c_new = f_g * c + i_g * g_g
        h_new = o_g * jnp.tanh(c_new)
        return h_new, c_new

    carry0 = (h_ref[...], c_ref[...])
    if t_total % t_chunk == 0:
        # Static trip count: partial unroll keeps LLO scheduler visibility
        # without blowing up code size (the chain is data-dependent anyway).
        h1, c1 = jax.lax.fori_loop(0, t_chunk, step, carry0, unroll=unroll)
    else:
        # Tail chunk is zero-padded along T; bound the loop dynamically so the
        # padded timesteps never touch the recurrent state.
        n_steps = jnp.minimum(t_chunk, t_total - chunk * t_chunk)
        h1, c1 = jax.lax.fori_loop(0, n_steps, step, carry0)
    h_ref[...] = h1
    c_ref[...] = c1

    # Linear head only on the final time chunk of this batch block.
    @pl.when(chunk == n_chunks - 1)
    def _():
        base = (jnp.dot(h1, w_h_ref[...], preferred_element_type=jnp.float32)
                + b_out_ref[...])                      # (Bb, P)
        qw = q_ref[...] * w_q_ref[...]                 # (Bb, P)
        out_ref[:, 0:P] = base + qw                    # head([h, q])
        if double:
            out_ref[:, P:2 * P] = base + (w_q_ref[...] - qw)   # head([h, 1-q])


def lstm_lattice_forward(x, quantile, params, valid_run=False, double_run=True,
                         t_chunk=64, matmul_dtype=jnp.float32):
    """x: (B, T, I) float32, quantile: (B, 1) float32 (output_size == 1).

    Weight layout (gate order i, f, g, o as in PyTorch nn.LSTM):
      w_ih[k] = weight_ih_l0[k*H:(k+1)*H].T     -> (4, I, H)
      w_hh[k] = weight_hh_l0[k*H:(k+1)*H].T     -> (4, H, H)
      bias[k] = (b_ih + b_hh)[k*H:(k+1)*H][None]-> (4, 1, H)
      w_h = linear.weight[:, :H].T (H, P); w_q = linear.weight[:, H:].T (1, P)
      b_out = linear.bias[None] (1, P)
    """
    B, T, I = x.shape
    H = params["w_hh"].shape[1]
    P = params["w_h"].shape[1]

    assert params["w_ih"].shape == (4, I, H), params["w_ih"].shape
    assert params["w_hh"].shape == (4, H, H), params["w_hh"].shape
    assert params["bias"].shape == (4, 1, H), params["bias"].shape
    assert params["w_h"].shape == (H, P) and params["w_q"].shape == (1, P)
    assert params["b_out"].shape == (1, P) and quantile.shape == (B, 1)

    double = bool(double_run and (not valid_run))
    out_w = 2 * P if double else P

    # --- time chunking (pipelined "arbitrary" grid axis) ---
    tc = int(min(t_chunk, T))
    n_chunks = (T + tc - 1) // tc
    t_pad = n_chunks * tc

    # Time-major so a (tc, Bb, I) block is a contiguous HBM slab.
    xt = jnp.transpose(x, (1, 0, 2)).astype(jnp.float32)        # (T, B, I)
    if t_pad != T:
        xt = jnp.pad(xt, ((0, t_pad - T), (0, 0), (0, 0)))

    # --- optional megacore batch split (v7x has 2 TensorCores per chip) ---
    n_batch_blocks = 2 if (B % 16 == 0) else 1
    Bb = B // n_batch_blocks

    unroll = int(min(8, tc))

    kernel = functools.partial(
        _lstm_linear_kernel, t_total=T, t_chunk=tc, double=double,
        unroll=unroll, matmul_dtype=matmul_dtype)

    rep3 = lambda b, i: (0, 0, 0)
    rep2 = lambda b, i: (0, 0)

    # Explicit VMEM budget (portable: v5e 16 MiB default scoped, v7x 64 MiB phys).
    fsz = 4
    est = (2 * tc * Bb * I * fsz                                   # x chunks (2x buffered)
           + 2 * (4 * I * H + 4 * H * H + 4 * H + H * P + 2 * P) * fsz   # weights
           + 2 * (Bb + Bb * out_w) * fsz                           # quantile + out
           + 2 * Bb * H * fsz                                      # h/c scratch
           + (1 << 20))
    vmem_limit = int(min(max(2 * est, 16 << 20), 48 << 20))

    out = pl.pallas_call(
        kernel,
        out_shape=jax.ShapeDtypeStruct((B, out_w), jnp.float32),
        grid=(n_batch_blocks, n_chunks),
        in_specs=[
            pl.BlockSpec((tc, Bb, I), lambda b, i: (i, b, 0)),     # x (streamed)
            pl.BlockSpec((4, I, H), rep3),                         # W_ih (resident)
            pl.BlockSpec((4, H, H), rep3),                         # W_hh (resident)
            pl.BlockSpec((4, 1, H), rep3),                         # bias
            pl.BlockSpec((Bb, 1), lambda b, i: (b, 0)),            # quantile
            pl.BlockSpec((H, P), rep2),                            # W_h
            pl.BlockSpec((1, P), rep2),                            # w_q
            pl.BlockSpec((1, P), rep2),                            # b_out
        ],
        out_specs=pl.BlockSpec((Bb, out_w), lambda b, i: (b, 0)),
        scratch_shapes=[
            pltpu.VMEM((Bb, H), jnp.float32),   # h carry across time chunks
            pltpu.VMEM((Bb, H), jnp.float32),   # c carry across time chunks
        ],
        compiler_params=pltpu.CompilerParams(
            dimension_semantics=("parallel", "arbitrary"),
            vmem_limit_bytes=vmem_limit),
    )(xt, params["w_ih"], params["w_hh"], params["bias"], quantile,
      params["w_h"], params["w_q"], params["b_out"])

    if double:
        # (B, P, 2): [..., 0] with quantile, [..., 1] with (1 - quantile)
        return jnp.stack([out[:, :P], out[:, P:]], axis=-1)
    return out[..., None]                                          # (B, P, 1)


def init_params(key, input_size, hidden_size, pred_length):
    ks = jax.random.split(key, 6)
    s = 0.1
    w_ih = s * jax.random.normal(ks[0], (4, input_size, hidden_size), jnp.float32)
    w_hh = s * jax.random.normal(ks[1], (4, hidden_size, hidden_size), jnp.float32)
    bias = s * jax.random.normal(ks[2], (4, 1, hidden_size), jnp.float32)
    w_h = s * jax.random.normal(ks[3], (hidden_size, pred_length), jnp.float32)
    w_q = s * jax.random.normal(ks[4], (1, pred_length), jnp.float32)
    b_out = s * jax.random.normal(ks[5], (1, pred_length), jnp.float32)
    return dict(w_ih=w_ih, w_hh=w_hh, bias=bias, w_h=w_h, w_q=w_q, b_out=b_out)


def _ref_forward(x, quantile, params, double):
    """Pure-JAX reference for correctness checking (same gate-major layout)."""
    B, T, _ = x.shape
    H = params["w_hh"].shape[1]
    h = jnp.zeros((B, H), jnp.float32)
    c = jnp.zeros((B, H), jnp.float32)
    for t in range(T):
        xt = x[:, t, :]
        pre = [xt @ params["w_ih"][k] + h @ params["w_hh"][k] + params["bias"][k]
               for k in range(4)]
        i_g = jax.nn.sigmoid(pre[0])
        f_g = jax.nn.sigmoid(pre[1])
        g_g = jnp.tanh(pre[2])
        o_g = jax.nn.sigmoid(pre[3])
        c = f_g * c + i_g * g_g
        h = o_g * jnp.tanh(c)
    base = h @ params["w_h"] + params["b_out"]
    out1 = base + quantile * params["w_q"]
    if double:
        out2 = base + (1.0 - quantile) * params["w_q"]
        return jnp.stack([out1, out2], axis=-1)
    return out1[..., None]


if __name__ == "__main__":
    B, T, I, H, P = 2, 8, 4, 32, 4   # batch, seq, input, hidden, pred_length

    key = jax.random.PRNGKey(0)
    k_x, k_q, k_p = jax.random.split(key, 3)

    x = jax.random.normal(k_x, (B, T, I), jnp.float32)
    quantile = jax.random.uniform(k_q, (B, 1), jnp.float32)   # output_size == 1
    params = init_params(k_p, I, H, P)

    # double_run path (calibration_sharpness_loss) -> (B, P, 2)
    out = lstm_lattice_forward(x, quantile, params, valid_run=False, double_run=True)
    out = jax.block_until_ready(out)
    assert out.shape == (B, P, 2), out.shape
    ref = _ref_forward(x, quantile, params, double=True)
    err = float(jnp.max(jnp.abs(out - ref)))
    assert jnp.allclose(out, ref, atol=2e-3, rtol=2e-3), err

    # single-run path -> (B, P, 1), out2 never computed
    out_s = lstm_lattice_forward(x, quantile, params, valid_run=True, double_run=True)
    out_s = jax.block_until_ready(out_s)
    assert out_s.shape == (B, P, 1), out_s.shape
    ref_s = _ref_forward(x, quantile, params, double=False)
    err_s = float(jnp.max(jnp.abs(out_s - ref_s)))
    assert jnp.allclose(out_s, ref_s, atol=2e-3, rtol=2e-3), err_s

    print("KERNEL_OK")
</pallas_src>

<mosaic_0001>
module attributes {stable_mosaic.version = 11 : i64} {
  func.func @_lstm_linear_kernel(%arg0: i32, %arg1: i32, %arg2: memref<8x2x4xf32, #tpu.memory_space<vmem>>, %arg3: memref<4x4x32xf32, #tpu.memory_space<vmem>>, %arg4: memref<4x32x32xf32, #tpu.memory_space<vmem>>, %arg5: memref<4x1x32xf32, #tpu.memory_space<vmem>>, %arg6: memref<2x1xf32, #tpu.memory_space<vmem>>, %arg7: memref<32x4xf32, #tpu.memory_space<vmem>>, %arg8: memref<1x4xf32, #tpu.memory_space<vmem>>, %arg9: memref<1x4xf32, #tpu.memory_space<vmem>>, %arg10: memref<2x8xf32, #tpu.memory_space<vmem>>, %arg11: memref<2x32xf32, #tpu.memory_space<vmem>>, %arg12: memref<2x32xf32, #tpu.memory_space<vmem>>) attributes {dimension_semantics = [#tpu.dimension_semantics<parallel>, #tpu.dimension_semantics<arbitrary>], iteration_bounds = array<i64: 1, 1>, scalar_prefetch = 0 : i64, scratch_operands = 2 : i64, tpu.core_type = #tpu.core_type<tc>, window_params = [{transform_indices = @transform_0, window_bounds = array<i64: 8, 2, 4>}, {pipeline_mode = #tpu.pipeline_mode<synchronous>, transform_indices = @transform_1, window_bounds = array<i64: 4, 4, 32>}, {pipeline_mode = #tpu.pipeline_mode<synchronous>, transform_indices = @transform_2, window_bounds = array<i64: 4, 32, 32>}, {pipeline_mode = #tpu.pipeline_mode<synchronous>, transform_indices = @transform_3, window_bounds = array<i64: 4, 1, 32>}, {transform_indices = @transform_4, window_bounds = array<i64: 2, 1>}, {pipeline_mode = #tpu.pipeline_mode<synchronous>, transform_indices = @transform_5, window_bounds = array<i64: 32, 4>}, {pipeline_mode = #tpu.pipeline_mode<synchronous>, transform_indices = @transform_6, window_bounds = array<i64: 1, 4>}, {pipeline_mode = #tpu.pipeline_mode<synchronous>, transform_indices = @transform_7, window_bounds = array<i64: 1, 4>}, {transform_indices = @transform_8, window_bounds = array<i64: 2, 8>}]} {
    %c0_i32 = arith.constant 0 : i32
    %0 = arith.cmpi eq, %arg1, %c0_i32 : i32
    %1 = arith.extui %0 : i1 to i32
    %c0_i32_0 = arith.constant 0 : i32
    %2 = arith.cmpi ne, %1, %c0_i32_0 : i32
    scf.if %2 {
      %cst_147 = arith.constant 0.000000e+00 : f32
      %386 = vector.broadcast %cst_147 : f32 to vector<2x32xf32>
      %c0_148 = arith.constant 0 : index
      %c0_149 = arith.constant 0 : index
      %387 = vector.load %arg11[%c0_148, %c0_149] : memref<2x32xf32, #tpu.memory_space<vmem>>, vector<2x32xf32>
      tpu.vector_store %arg11[%c0_148, %c0_149], %386 {strides = array<i32>} : memref<2x32xf32, #tpu.memory_space<vmem>>, vector<2x32xf32>,
      %cst_150 = arith.constant 0.000000e+00 : f32
      %388 = vector.broadcast %cst_150 : f32 to vector<2x32xf32>
      %c0_151 = arith.constant 0 : index
      %c0_152 = arith.constant 0 : index
      %389 = vector.load %arg12[%c0_151, %c0_152] : memref<2x32xf32, #tpu.memory_space<vmem>>, vector<2x32xf32>
      tpu.vector_store %arg12[%c0_151, %c0_152], %388 {strides = array<i32>} : memref<2x32xf32, #tpu.memory_space<vmem>>, vector<2x32xf32>,
    } else {
    }
    %c0 = arith.constant 0 : index
    %c0_1 = arith.constant 0 : index
    %c0_2 = arith.constant 0 : index
    %3 = vector.load %arg3[%c0, %c0_1, %c0_2] : memref<4x4x32xf32, #tpu.memory_space<vmem>>, vector<1x4x32xf32>
    %4 = vector.shape_cast %3 : vector<1x4x32xf32> to vector<4x32xf32>
    %c1 = arith.constant 1 : index
    %c0_3 = arith.constant 0 : index
    %c0_4 = arith.constant 0 : index
    %5 = vector.load %arg3[%c1, %c0_3, %c0_4] : memref<4x4x32xf32, #tpu.memory_space<vmem>>, vector<1x4x32xf32>
    %6 = vector.shape_cast %5 : vector<1x4x32xf32> to vector<4x32xf32>
    %c2 = arith.constant 2 : index
    %c0_5 = arith.constant 0 : index
    %c0_6 = arith.constant 0 : index
    %7 = vector.load %arg3[%c2, %c0_5, %c0_6] : memref<4x4x32xf32, #tpu.memory_space<vmem>>, vector<1x4x32xf32>
    %8 = vector.shape_cast %7 : vector<1x4x32xf32> to vector<4x32xf32>
    %c3 = arith.constant 3 : index
    %c0_7 = arith.constant 0 : index
    %c0_8 = arith.constant 0 : index
    %9 = vector.load %arg3[%c3, %c0_7, %c0_8] : memref<4x4x32xf32, #tpu.memory_space<vmem>>, vector<1x4x32xf32>
    %10 = vector.shape_cast %9 : vector<1x4x32xf32> to vector<4x32xf32>
    %c0_9 = arith.constant 0 : index
    %c0_10 = arith.constant 0 : index
    %c0_11 = arith.constant 0 : index
    %11 = vector.load %arg4[%c0_9, %c0_10, %c0_11] : memref<4x32x32xf32, #tpu.memory_space<vmem>>, vector<1x32x32xf32>
    %12 = vector.shape_cast %11 : vector<1x32x32xf32> to vector<32x32xf32>
    %c1_12 = arith.constant 1 : index
    %c0_13 = arith.constant 0 : index
    %c0_14 = arith.constant 0 : index
    %13 = vector.load %arg4[%c1_12, %c0_13, %c0_14] : memref<4x32x32xf32, #tpu.memory_space<vmem>>, vector<1x32x32xf32>
    %14 = vector.shape_cast %13 : vector<1x32x32xf32> to vector<32x32xf32>
    %c2_15 = arith.constant 2 : index
    %c0_16 = arith.constant 0 : index
    %c0_17 = arith.constant 0 : index
    %15 = vector.load %arg4[%c2_15, %c0_16, %c0_17] : memref<4x32x32xf32, #tpu.memory_space<vmem>>, vector<1x32x32xf32>
    %16 = vector.shape_cast %15 : vector<1x32x32xf32> to vector<32x32xf32>
    %c3_18 = arith.constant 3 : index
    %c0_19 = arith.constant 0 : index
    %c0_20 = arith.constant 0 : index
    %17 = vector.load %arg4[%c3_18, %c0_19, %c0_20] : memref<4x32x32xf32, #tpu.memory_space<vmem>>, vector<1x32x32xf32>
    %18 = vector.shape_cast %17 : vector<1x32x32xf32> to vector<32x32xf32>
    %c0_21 = arith.constant 0 : index
    %c0_22 = arith.constant 0 : index
    %c0_23 = arith.constant 0 : index
    %19 = vector.load %arg5[%c0_21, %c0_22, %c0_23] : memref<4x1x32xf32, #tpu.memory_space<vmem>>, vector<1x1x32xf32>
    %20 = vector.shape_cast %19 : vector<1x1x32xf32> to vector<1x32xf32>
    %c1_24 = arith.constant 1 : index
    %c0_25 = arith.constant 0 : index
    %c0_26 = arith.constant 0 : index
    %21 = vector.load %arg5[%c1_24, %c0_25, %c0_26] : memref<4x1x32xf32, #tpu.memory_space<vmem>>, vector<1x1x32xf32>
    %22 = vector.shape_cast %21 : vector<1x1x32xf32> to vector<1x32xf32>
    %c2_27 = arith.constant 2 : index
    %c0_28 = arith.constant 0 : index
    %c0_29 = arith.constant 0 : index
    %23 = vector.load %arg5[%c2_27, %c0_28, %c0_29] : memref<4x1x32xf32, #tpu.memory_space<vmem>>, vector<1x1x32xf32>
    %24 = vector.shape_cast %23 : vector<1x1x32xf32> to vector<1x32xf32>
    %c3_30 = arith.constant 3 : index
    %c0_31 = arith.constant 0 : index
    %c0_32 = arith.constant 0 : index
    %25 = vector.load %arg5[%c3_30, %c0_31, %c0_32] : memref<4x1x32xf32, #tpu.memory_space<vmem>>, vector<1x1x32xf32>
    %26 = vector.shape_cast %25 : vector<1x1x32xf32> to vector<1x32xf32>
    %c0_33 = arith.constant 0 : index
    %c0_34 = arith.constant 0 : index
    %27 = vector.load %arg11[%c0_33, %c0_34] : memref<2x32xf32, #tpu.memory_space<vmem>>, vector<2x32xf32>
    %c0_35 = arith.constant 0 : index
    %c0_36 = arith.constant 0 : index
    %28 = vector.load %arg12[%c0_35, %c0_36] : memref<2x32xf32, #tpu.memory_space<vmem>>, vector<2x32xf32>
    %c0_i32_37 = arith.constant 0 : i32
    %29 = arith.index_cast %c0_i32_37 : i32 to index
    %c0_38 = arith.constant 0 : index
    %c0_39 = arith.constant 0 : index
    %30 = vector.load %arg2[%29, %c0_38, %c0_39] : memref<8x2x4xf32, #tpu.memory_space<vmem>>, vector<1x2x4xf32>
    %31 = vector.shape_cast %30 : vector<1x2x4xf32> to vector<2x4xf32>
    %cst = arith.constant dense<0.000000e+00> : vector<2x32xf32>
    %32 = tpu.matmul %31, %4, %cst {dimension_numbers = #tpu.dot_dimension_numbers<[1], [0], [0], [1], [0, 0, 1, 1], [], []>} : vector<2x4xf32>, vector<4x32xf32>, vector<2x32xf32> -> vector<2x32xf32>
    %cst_40 = arith.constant dense<0.000000e+00> : vector<2x32xf32>
    %33 = tpu.matmul %27, %12, %cst_40 {dimension_numbers = #tpu.dot_dimension_numbers<[1], [0], [0], [1], [0, 0, 1, 1], [], []>} : vector<2x32xf32>, vector<32x32xf32>, vector<2x32xf32> -> vector<2x32xf32>
    %34 = arith.addf %32, %33 : vector<2x32xf32>
    %35 = vector.broadcast %20 : vector<1x32xf32> to vector<2x32xf32>
    %36 = arith.addf %34, %35 : vector<2x32xf32>
    %cst_41 = arith.constant dense<0.000000e+00> : vector<2x32xf32>
    %37 = tpu.matmul %31, %6, %cst_41 {dimension_numbers = #tpu.dot_dimension_numbers<[1], [0], [0], [1], [0, 0, 1, 1], [], []>} : vector<2x4xf32>, vector<4x32xf32>, vector<2x32xf32> -> vector<2x32xf32>
    %cst_42 = arith.constant dense<0.000000e+00> : vector<2x32xf32>
    %38 = tpu.matmul %27, %14, %cst_42 {dimension_numbers = #tpu.dot_dimension_numbers<[1], [0], [0], [1], [0, 0, 1, 1], [], []>} : vector<2x32xf32>, vector<32x32xf32>, vector<2x32xf32> -> vector<2x32xf32>
    %39 = arith.addf %37, %38 : vector<2x32xf32>
    %40 = vector.broadcast %22 : vector<1x32xf32> to vector<2x32xf32>
    %41 = arith.addf %39, %40 : vector<2x32xf32>
    %cst_43 = arith.constant dense<0.000000e+00> : vector<2x32xf32>
    %42 = tpu.matmul %31, %8, %cst_43 {dimension_numbers = #tpu.dot_dimension_numbers<[1], [0], [0], [1], [0, 0, 1, 1], [], []>} : vector<2x4xf32>, vector<4x32xf32>, vector<2x32xf32> -> vector<2x32xf32>
    %cst_44 = arith.constant dense<0.000000e+00> : vector<2x32xf32>
    %43 = tpu.matmul %27, %16, %cst_44 {dimension_numbers = #tpu.dot_dimension_numbers<[1], [0], [0], [1], [0, 0, 1, 1], [], []>} : vector<2x32xf32>, vector<32x32xf32>, vector<2x32xf32> -> vector<2x32xf32>
    %44 = arith.addf %42, %43 : vector<2x32xf32>
    %45 = vector.broadcast %24 : vector<1x32xf32> to vector<2x32xf32>
    %46 = arith.addf %44, %45 : vector<2x32xf32>
    %cst_45 = arith.constant dense<0.000000e+00> : vector<2x32xf32>
    %47 = tpu.matmul %31, %10, %cst_45 {dimension_numbers = #tpu.dot_dimension_numbers<[1], [0], [0], [1], [0, 0, 1, 1], [], []>} : vector<2x4xf32>, vector<4x32xf32>, vector<2x32xf32> -> vector<2x32xf32>
    %cst_46 = arith.constant dense<0.000000e+00> : vector<2x32xf32>
    %48 = tpu.matmul %27, %18, %cst_46 {dimension_numbers = #tpu.dot_dimension_numbers<[1], [0], [0], [1], [0, 0, 1, 1], [], []>} : vector<2x32xf32>, vector<32x32xf32>, vector<2x32xf32> -> vector<2x32xf32>
    %49 = arith.addf %47, %48 : vector<2x32xf32>
    %50 = vector.broadcast %26 : vector<1x32xf32> to vector<2x32xf32>
    %51 = arith.addf %49, %50 : vector<2x32xf32>
    %52 = arith.negf %36 : vector<2x32xf32>
    %53 = math.exp %52 : vector<2x32xf32>
    %cst_47 = arith.constant 1.000000e+00 : f32
    %54 = vector.broadcast %cst_47 : f32 to vector<2x32xf32>
    %55 = arith.addf %54, %53 : vector<2x32xf32>
    %56 = arith.divf %54, %55 : vector<2x32xf32>
    %57 = arith.negf %41 : vector<2x32xf32>
    %58 = math.exp %57 : vector<2x32xf32>
    %cst_48 = arith.constant 1.000000e+00 : f32
    %59 = vector.broadcast %cst_48 : f32 to vector<2x32xf32>
    %60 = arith.addf %59, %58 : vector<2x32xf32>
    %61 = arith.divf %59, %60 : vector<2x32xf32>
    %62 = math.tanh %46 : vector<2x32xf32>
    %63 = arith.negf %51 : vector<2x32xf32>
    %64 = math.exp %63 : vector<2x32xf32>
    %cst_49 = arith.constant 1.000000e+00 : f32
    %65 = vector.broadcast %cst_49 : f32 to vector<2x32xf32>
    %66 = arith.addf %65, %64 : vector<2x32xf32>
    %67 = arith.divf %65, %66 : vector<2x32xf32>
    %68 = arith.mulf %61, %28 : vector<2x32xf32>
    %69 = arith.mulf %56, %62 : vector<2x32xf32>
    %70 = arith.addf %68, %69 : vector<2x32xf32>
    %71 = math.tanh %70 : vector<2x32xf32>
    %72 = arith.mulf %67, %71 : vector<2x32xf32>
    %c1_i32 = arith.constant 1 : i32
    %73 = arith.index_cast %c1_i32 : i32 to index
    %c0_50 = arith.constant 0 : index
    %c0_51 = arith.constant 0 : index
    %74 = vector.load %arg2[%73, %c0_50, %c0_51] : memref<8x2x4xf32, #tpu.memory_space<vmem>>, vector<1x2x4xf32>
    %75 = vector.shape_cast %74 : vector<1x2x4xf32> to vector<2x4xf32>
    %cst_52 = arith.constant dense<0.000000e+00> : vector<2x32xf32>
    %76 = tpu.matmul %75, %4, %cst_52 {dimension_numbers = #tpu.dot_dimension_numbers<[1], [0], [0], [1], [0, 0, 1, 1], [], []>} : vector<2x4xf32>, vector<4x32xf32>, vector<2x32xf32> -> vector<2x32xf32>
    %cst_53 = arith.constant dense<0.000000e+00> : vector<2x32xf32>
    %77 = tpu.matmul %72, %12, %cst_53 {dimension_numbers = #tpu.dot_dimension_numbers<[1], [0], [0], [1], [0, 0, 1, 1], [], []>} : vector<2x32xf32>, vector<32x32xf32>, vector<2x32xf32> -> vector<2x32xf32>
    %78 = arith.addf %76, %77 : vector<2x32xf32>
    %79 = vector.broadcast %20 : vector<1x32xf32> to vector<2x32xf32>
    %80 = arith.addf %78, %79 : vector<2x32xf32>
    %cst_54 = arith.constant dense<0.000000e+00> : vector<2x32xf32>
    %81 = tpu.matmul %75, %6, %cst_54 {dimension_numbers = #tpu.dot_dimension_numbers<[1], [0], [0], [1], [0, 0, 1, 1], [], []>} : vector<2x4xf32>, vector<4x32xf32>, vector<2x32xf32> -> vector<2x32xf32>
    %cst_55 = arith.constant dense<0.000000e+00> : vector<2x32xf32>
    %82 = tpu.matmul %72, %14, %cst_55 {dimension_numbers = #tpu.dot_dimension_numbers<[1], [0], [0], [1], [0, 0, 1, 1], [], []>} : vector<2x32xf32>, vector<32x32xf32>, vector<2x32xf32> -> vector<2x32xf32>
    %83 = arith.addf %81, %82 : vector<2x32xf32>
    %84 = vector.broadcast %22 : vector<1x32xf32> to vector<2x32xf32>
    %85 = arith.addf %83, %84 : vector<2x32xf32>
    %cst_56 = arith.constant dense<0.000000e+00> : vector<2x32xf32>
    %86 = tpu.matmul %75, %8, %cst_56 {dimension_numbers = #tpu.dot_dimension_numbers<[1], [0], [0], [1], [0, 0, 1, 1], [], []>} : vector<2x4xf32>, vector<4x32xf32>, vector<2x32xf32> -> vector<2x32xf32>
    %cst_57 = arith.constant dense<0.000000e+00> : vector<2x32xf32>
    %87 = tpu.matmul %72, %16, %cst_57 {dimension_numbers = #tpu.dot_dimension_numbers<[1], [0], [0], [1], [0, 0, 1, 1], [], []>} : vector<2x32xf32>, vector<32x32xf32>, vector<2x32xf32> -> vector<2x32xf32>
    %88 = arith.addf %86, %87 : vector<2x32xf32>
    %89 = vector.broadcast %24 : vector<1x32xf32> to vector<2x32xf32>
    %90 = arith.addf %88, %89 : vector<2x32xf32>
    %cst_58 = arith.constant dense<0.000000e+00> : vector<2x32xf32>
    %91 = tpu.matmul %75, %10, %cst_58 {dimension_numbers = #tpu.dot_dimension_numbers<[1], [0], [0], [1], [0, 0, 1, 1], [], []>} : vector<2x4xf32>, vector<4x32xf32>, vector<2x32xf32> -> vector<2x32xf32>
    %cst_59 = arith.constant dense<0.000000e+00> : vector<2x32xf32>
    %92 = tpu.matmul %72, %18, %cst_59 {dimension_numbers = #tpu.dot_dimension_numbers<[1], [0], [0], [1], [0, 0, 1, 1], [], []>} : vector<2x32xf32>, vector<32x32xf32>, vector<2x32xf32> -> vector<2x32xf32>
    %93 = arith.addf %91, %92 : vector<2x32xf32>
    %94 = vector.broadcast %26 : vector<1x32xf32> to vector<2x32xf32>
    %95 = arith.addf %93, %94 : vector<2x32xf32>
    %96 = arith.negf %80 : vector<2x32xf32>
    %97 = math.exp %96 : vector<2x32xf32>
    %cst_60 = arith.constant 1.000000e+00 : f32
    %98 = vector.broadcast %cst_60 : f32 to vector<2x32xf32>
    %99 = arith.addf %98, %97 : vector<2x32xf32>
    %100 = arith.divf %98, %99 : vector<2x32xf32>
    %101 = arith.negf %85 : vector<2x32xf32>
    %102 = math.exp %101 : vector<2x32xf32>
    %cst_61 = arith.constant 1.000000e+00 : f32
    %103 = vector.broadcast %cst_61 : f32 to vector<2x32xf32>
    %104 = arith.addf %103, %102 : vector<2x32xf32>
    %105 = arith.divf %103, %104 : vector<2x32xf32>
    %106 = math.tanh %90 : vector<2x32xf32>
    %107 = arith.negf %95 : vector<2x32xf32>
    %108 = math.exp %107 : vector<2x32xf32>
    %cst_62 = arith.constant 1.000000e+00 : f32
    %109 = vector.broadcast %cst_62 : f32 to vector<2x32xf32>
    %110 = arith.addf %109, %108 : vector<2x32xf32>
    %111 = arith.divf %109, %110 : vector<2x32xf32>
    %112 = arith.mulf %105, %70 : vector<2x32xf32>
    %113 = arith.mulf %100, %106 : vector<2x32xf32>
    %114 = arith.addf %112, %113 : vector<2x32xf32>
    %115 = math.tanh %114 : vector<2x32xf32>
    %116 = arith.mulf %111, %115 : vector<2x32xf32>
    %c2_i32 = arith.constant 2 : i32
    %117 = arith.index_cast %c2_i32 : i32 to index
    %c0_63 = arith.constant 0 : index
    %c0_64 = arith.constant 0 : index
    %118 = vector.load %arg2[%117, %c0_63, %c0_64] : memref<8x2x4xf32, #tpu.memory_space<vmem>>, vector<1x2x4xf32>
    %119 = vector.shape_cast %118 : vector<1x2x4xf32> to vector<2x4xf32>
    %cst_65 = arith.constant dense<0.000000e+00> : vector<2x32xf32>
    %120 = tpu.matmul %119, %4, %cst_65 {dimension_numbers = #tpu.dot_dimension_numbers<[1], [0], [0], [1], [0, 0, 1, 1], [], []>} : vector<2x4xf32>, vector<4x32xf32>, vector<2x32xf32> -> vector<2x32xf32>
    %cst_66 = arith.constant dense<0.000000e+00> : vector<2x32xf32>
    %121 = tpu.matmul %116, %12, %cst_66 {dimension_numbers = #tpu.dot_dimension_numbers<[1], [0], [0], [1], [0, 0, 1, 1], [], []>} : vector<2x32xf32>, vector<32x32xf32>, vector<2x32xf32> -> vector<2x32xf32>
    %122 = arith.addf %120, %121 : vector<2x32xf32>
    %123 = vector.broadcast %20 : vector<1x32xf32> to vector<2x32xf32>
    %124 = arith.addf %122, %123 : vector<2x32xf32>
    %cst_67 = arith.constant dense<0.000000e+00> : vector<2x32xf32>
    %125 = tpu.matmul %119, %6, %cst_67 {dimension_numbers = #tpu.dot_dimension_numbers<[1], [0], [0], [1], [0, 0, 1, 1], [], []>} : vector<2x4xf32>, vector<4x32xf32>, vector<2x32xf32> -> vector<2x32xf32>
    %cst_68 = arith.constant dense<0.000000e+00> : vector<2x32xf32>
    %126 = tpu.matmul %116, %14, %cst_68 {dimension_numbers = #tpu.dot_dimension_numbers<[1], [0], [0], [1], [0, 0, 1, 1], [], []>} : vector<2x32xf32>, vector<32x32xf32>, vector<2x32xf32> -> vector<2x32xf32>
    %127 = arith.addf %125, %126 : vector<2x32xf32>
    %128 = vector.broadcast %22 : vector<1x32xf32> to vector<2x32xf32>
    %129 = arith.addf %127, %128 : vector<2x32xf32>
    %cst_69 = arith.constant dense<0.000000e+00> : vector<2x32xf32>
    %130 = tpu.matmul %119, %8, %cst_69 {dimension_numbers = #tpu.dot_dimension_numbers<[1], [0], [0], [1], [0, 0, 1, 1], [], []>} : vector<2x4xf32>, vector<4x32xf32>, vector<2x32xf32> -> vector<2x32xf32>
    %cst_70 = arith.constant dense<0.000000e+00> : vector<2x32xf32>
    %131 = tpu.matmul %116, %16, %cst_70 {dimension_numbers = #tpu.dot_dimension_numbers<[1], [0], [0], [1], [0, 0, 1, 1], [], []>} : vector<2x32xf32>, vector<32x32xf32>, vector<2x32xf32> -> vector<2x32xf32>
    %132 = arith.addf %130, %131 : vector<2x32xf32>
    %133 = vector.broadcast %24 : vector<1x32xf32> to vector<2x32xf32>
    %134 = arith.addf %132, %133 : vector<2x32xf32>
    %cst_71 = arith.constant dense<0.000000e+00> : vector<2x32xf32>
    %135 = tpu.matmul %119, %10, %cst_71 {dimension_numbers = #tpu.dot_dimension_numbers<[1], [0], [0], [1], [0, 0, 1, 1], [], []>} : vector<2x4xf32>, vector<4x32xf32>, vector<2x32xf32> -> vector<2x32xf32>
    %cst_72 = arith.constant dense<0.000000e+00> : vector<2x32xf32>
    %136 = tpu.matmul %116, %18, %cst_72 {dimension_numbers = #tpu.dot_dimension_numbers<[1], [0], [0], [1], [0, 0, 1, 1], [], []>} : vector<2x32xf32>, vector<32x32xf32>, vector<2x32xf32> -> vector<2x32xf32>
    %137 = arith.addf %135, %136 : vector<2x32xf32>
    %138 = vector.broadcast %26 : vector<1x32xf32> to vector<2x32xf32>
    %139 = arith.addf %137, %138 : vector<2x32xf32>
    %140 = arith.negf %124 : vector<2x32xf32>
    %141 = math.exp %140 : vector<2x32xf32>
    %cst_73 = arith.constant 1.000000e+00 : f32
    %142 = vector.broadcast %cst_73 : f32 to vector<2x32xf32>
    %143 = arith.addf %142, %141 : vector<2x32xf32>
    %144 = arith.divf %142, %143 : vector<2x32xf32>
    %145 = arith.negf %129 : vector<2x32xf32>
    %146 = math.exp %145 : vector<2x32xf32>
    %cst_74 = arith.constant 1.000000e+00 : f32
    %147 = vector.broadcast %cst_74 : f32 to vector<2x32xf32>
    %148 = arith.addf %147, %146 : vector<2x32xf32>
    %149 = arith.divf %147, %148 : vector<2x32xf32>
    %150 = math.tanh %134 : vector<2x32xf32>
    %151 = arith.negf %139 : vector<2x32xf32>
    %152 = math.exp %151 : vector<2x32xf32>
    %cst_75 = arith.constant 1.000000e+00 : f32
    %153 = vector.broadcast %cst_75 : f32 to vector<2x32xf32>
    %154 = arith.addf %153, %152 : vector<2x32xf32>
    %155 = arith.divf %153, %154 : vector<2x32xf32>
    %156 = arith.mulf %149, %114 : vector<2x32xf32>
    %157 = arith.mulf %144, %150 : vector<2x32xf32>
    %158 = arith.addf %156, %157 : vector<2x32xf32>
    %159 = math.tanh %158 : vector<2x32xf32>
    %160 = arith.mulf %155, %159 : vector<2x32xf32>
    %c3_i32 = arith.constant 3 : i32
    %161 = arith.index_cast %c3_i32 : i32 to index
    %c0_76 = arith.constant 0 : index
    %c0_77 = arith.constant 0 : index
    %162 = vector.load %arg2[%161, %c0_76, %c0_77] : memref<8x2x4xf32, #tpu.memory_space<vmem>>, vector<1x2x4xf32>
    %163 = vector.shape_cast %162 : vector<1x2x4xf32> to vector<2x4xf32>
    %cst_78 = arith.constant dense<0.000000e+00> : vector<2x32xf32>
    %164 = tpu.matmul %163, %4, %cst_78 {dimension_numbers = #tpu.dot_dimension_numbers<[1], [0], [0], [1], [0, 0, 1, 1], [], []>} : vector<2x4xf32>, vector<4x32xf32>, vector<2x32xf32> -> vector<2x32xf32>
    %cst_79 = arith.constant dense<0.000000e+00> : vector<2x32xf32>
    %165 = tpu.matmul %160, %12, %cst_79 {dimension_numbers = #tpu.dot_dimension_numbers<[1], [0], [0], [1], [0, 0, 1, 1], [], []>} : vector<2x32xf32>, vector<32x32xf32>, vector<2x32xf32> -> vector<2x32xf32>
    %166 = arith.addf %164, %165 : vector<2x32xf32>
    %167 = vector.broadcast %20 : vector<1x32xf32> to vector<2x32xf32>
    %168 = arith.addf %166, %167 : vector<2x32xf32>
    %cst_80 = arith.constant dense<0.000000e+00> : vector<2x32xf32>
    %169 = tpu.matmul %163, %6, %cst_80 {dimension_numbers = #tpu.dot_dimension_numbers<[1], [0], [0], [1], [0, 0, 1, 1], [], []>} : vector<2x4xf32>, vector<4x32xf32>, vector<2x32xf32> -> vector<2x32xf32>
    %cst_81 = arith.constant dense<0.000000e+00> : vector<2x32xf32>
    %170 = tpu.matmul %160, %14, %cst_81 {dimension_numbers = #tpu.dot_dimension_numbers<[1], [0], [0], [1], [0, 0, 1, 1], [], []>} : vector<2x32xf32>, vector<32x32xf32>, vector<2x32xf32> -> vector<2x32xf32>
    %171 = arith.addf %169, %170 : vector<2x32xf32>
    %172 = vector.broadcast %22 : vector<1x32xf32> to vector<2x32xf32>
    %173 = arith.addf %171, %172 : vector<2x32xf32>
    %cst_82 = arith.constant dense<0.000000e+00> : vector<2x32xf32>
    %174 = tpu.matmul %163, %8, %cst_82 {dimension_numbers = #tpu.dot_dimension_numbers<[1], [0], [0], [1], [0, 0, 1, 1], [], []>} : vector<2x4xf32>, vector<4x32xf32>, vector<2x32xf32> -> vector<2x32xf32>
    %cst_83 = arith.constant dense<0.000000e+00> : vector<2x32xf32>
    %175 = tpu.matmul %160, %16, %cst_83 {dimension_numbers = #tpu.dot_dimension_numbers<[1], [0], [0], [1], [0, 0, 1, 1], [], []>} : vector<2x32xf32>, vector<32x32xf32>, vector<2x32xf32> -> vector<2x32xf32>
    %176 = arith.addf %174, %175 : vector<2x32xf32>
    %177 = vector.broadcast %24 : vector<1x32xf32> to vector<2x32xf32>
    %178 = arith.addf %176, %177 : vector<2x32xf32>
    %cst_84 = arith.constant dense<0.000000e+00> : vector<2x32xf32>
    %179 = tpu.matmul %163, %10, %cst_84 {dimension_numbers = #tpu.dot_dimension_numbers<[1], [0], [0], [1], [0, 0, 1, 1], [], []>} : vector<2x4xf32>, vector<4x32xf32>, vector<2x32xf32> -> vector<2x32xf32>
    %cst_85 = arith.constant dense<0.000000e+00> : vector<2x32xf32>
    %180 = tpu.matmul %160, %18, %cst_85 {dimension_numbers = #tpu.dot_dimension_numbers<[1], [0], [0], [1], [0, 0, 1, 1], [], []>} : vector<2x32xf32>, vector<32x32xf32>, vector<2x32xf32> -> vector<2x32xf32>
    %181 = arith.addf %179, %180 : vector<2x32xf32>
    %182 = vector.broadcast %26 : vector<1x32xf32> to vector<2x32xf32>
    %183 = arith.addf %181, %182 : vector<2x32xf32>
    %184 = arith.negf %168 : vector<2x32xf32>
    %185 = math.exp %184 : vector<2x32xf32>
    %cst_86 = arith.constant 1.000000e+00 : f32
    %186 = vector.broadcast %cst_86 : f32 to vector<2x32xf32>
    %187 = arith.addf %186, %185 : vector<2x32xf32>
    %188 = arith.divf %186, %187 : vector<2x32xf32>
    %189 = arith.negf %173 : vector<2x32xf32>
    %190 = math.exp %189 : vector<2x32xf32>
    %cst_87 = arith.constant 1.000000e+00 : f32
    %191 = vector.broadcast %cst_87 : f32 to vector<2x32xf32>
    %192 = arith.addf %191, %190 : vector<2x32xf32>
    %193 = arith.divf %191, %192 : vector<2x32xf32>
    %194 = math.tanh %178 : vector<2x32xf32>
    %195 = arith.negf %183 : vector<2x32xf32>
    %196 = math.exp %195 : vector<2x32xf32>
    %cst_88 = arith.constant 1.000000e+00 : f32
    %197 = vector.broadcast %cst_88 : f32 to vector<2x32xf32>
    %198 = arith.addf %197, %196 : vector<2x32xf32>
    %199 = arith.divf %197, %198 : vector<2x32xf32>
    %200 = arith.mulf %193, %158 : vector<2x32xf32>
    %201 = arith.mulf %188, %194 : vector<2x32xf32>
    %202 = arith.addf %200, %201 : vector<2x32xf32>
    %203 = math.tanh %202 : vector<2x32xf32>
    %204 = arith.mulf %199, %203 : vector<2x32xf32>
    %c4_i32 = arith.constant 4 : i32
    %205 = arith.index_cast %c4_i32 : i32 to index
    %c0_89 = arith.constant 0 : index
    %c0_90 = arith.constant 0 : index
    %206 = vector.load %arg2[%205, %c0_89, %c0_90] : memref<8x2x4xf32, #tpu.memory_space<vmem>>, vector<1x2x4xf32>
    %207 = vector.shape_cast %206 : vector<1x2x4xf32> to vector<2x4xf32>
    %cst_91 = arith.constant dense<0.000000e+00> : vector<2x32xf32>
    %208 = tpu.matmul %207, %4, %cst_91 {dimension_numbers = #tpu.dot_dimension_numbers<[1], [0], [0], [1], [0, 0, 1, 1], [], []>} : vector<2x4xf32>, vector<4x32xf32>, vector<2x32xf32> -> vector<2x32xf32>
    %cst_92 = arith.constant dense<0.000000e+00> : vector<2x32xf32>
    %209 = tpu.matmul %204, %12, %cst_92 {dimension_numbers = #tpu.dot_dimension_numbers<[1], [0], [0], [1], [0, 0, 1, 1], [], []>} : vector<2x32xf32>, vector<32x32xf32>, vector<2x32xf32> -> vector<2x32xf32>
    %210 = arith.addf %208, %209 : vector<2x32xf32>
    %211 = vector.broadcast %20 : vector<1x32xf32> to vector<2x32xf32>
    %212 = arith.addf %210, %211 : vector<2x32xf32>
    %cst_93 = arith.constant dense<0.000000e+00> : vector<2x32xf32>
    %213 = tpu.matmul %207, %6, %cst_93 {dimension_numbers = #tpu.dot_dimension_numbers<[1], [0], [0], [1], [0, 0, 1, 1], [], []>} : vector<2x4xf32>, vector<4x32xf32>, vector<2x32xf32> -> vector<2x32xf32>
    %cst_94 = arith.constant dense<0.000000e+00> : vector<2x32xf32>
    %214 = tpu.matmul %204, %14, %cst_94 {dimension_numbers = #tpu.dot_dimension_numbers<[1], [0], [0], [1], [0, 0, 1, 1], [], []>} : vector<2x32xf32>, vector<32x32xf32>, vector<2x32xf32> -> vector<2x32xf32>
    %215 = arith.addf %213, %214 : vector<2x32xf32>
    %216 = vector.broadcast %22 : vector<1x32xf32> to vector<2x32xf32>
    %217 = arith.addf %215, %216 : vector<2x32xf32>
    %cst_95 = arith.constant dense<0.000000e+00> : vector<2x32xf32>
    %218 = tpu.matmul %207, %8, %cst_95 {dimension_numbers = #tpu.dot_dimension_numbers<[1], [0], [0], [1], [0, 0, 1, 1], [], []>} : vector<2x4xf32>, vector<4x32xf32>, vector<2x32xf32> -> vector<2x32xf32>
    %cst_96 = arith.constant dense<0.000000e+00> : vector<2x32xf32>
    %219 = tpu.matmul %204, %16, %cst_96 {dimension_numbers = #tpu.dot_dimension_numbers<[1], [0], [0], [1], [0, 0, 1, 1], [], []>} : vector<2x32xf32>, vector<32x32xf32>, vector<2x32xf32> -> vector<2x32xf32>
    %220 = arith.addf %218, %219 : vector<2x32xf32>
    %221 = vector.broadcast %24 : vector<1x32xf32> to vector<2x32xf32>
    %222 = arith.addf %220, %221 : vector<2x32xf32>
    %cst_97 = arith.constant dense<0.000000e+00> : vector<2x32xf32>
    %223 = tpu.matmul %207, %10, %cst_97 {dimension_numbers = #tpu.dot_dimension_numbers<[1], [0], [0], [1], [0, 0, 1, 1], [], []>} : vector<2x4xf32>, vector<4x32xf32>, vector<2x32xf32> -> vector<2x32xf32>
    %cst_98 = arith.constant dense<0.000000e+00> : vector<2x32xf32>
    %224 = tpu.matmul %204, %18, %cst_98 {dimension_numbers = #tpu.dot_dimension_numbers<[1], [0], [0], [1], [0, 0, 1, 1], [], []>} : vector<2x32xf32>, vector<32x32xf32>, vector<2x32xf32> -> vector<2x32xf32>
    %225 = arith.addf %223, %224 : vector<2x32xf32>
    %226 = vector.broadcast %26 : vector<1x32xf32> to vector<2x32xf32>
    %227 = arith.addf %225, %226 : vector<2x32xf32>
    %228 = arith.negf %212 : vector<2x32xf32>
    %229 = math.exp %228 : vector<2x32xf32>
    %cst_99 = arith.constant 1.000000e+00 : f32
    %230 = vector.broadcast %cst_99 : f32 to vector<2x32xf32>
    %231 = arith.addf %230, %229 : vector<2x32xf32>
    %232 = arith.divf %230, %231 : vector<2x32xf32>
    %233 = arith.negf %217 : vector<2x32xf32>
    %234 = math.exp %233 : vector<2x32xf32>
    %cst_100 = arith.constant 1.000000e+00 : f32
    %235 = vector.broadcast %cst_100 : f32 to vector<2x32xf32>
    %236 = arith.addf %235, %234 : vector<2x32xf32>
    %237 = arith.divf %235, %236 : vector<2x32xf32>
    %238 = math.tanh %222 : vector<2x32xf32>
    %239 = arith.negf %227 : vector<2x32xf32>
    %240 = math.exp %239 : vector<2x32xf32>
    %cst_101 = arith.constant 1.000000e+00 : f32
    %241 = vector.broadcast %cst_101 : f32 to vector<2x32xf32>
    %242 = arith.addf %241, %240 : vector<2x32xf32>
    %243 = arith.divf %241, %242 : vector<2x32xf32>
    %244 = arith.mulf %237, %202 : vector<2x32xf32>
    %245 = arith.mulf %232, %238 : vector<2x32xf32>
    %246 = arith.addf %244, %245 : vector<2x32xf32>
    %247 = math.tanh %246 : vector<2x32xf32>
    %248 = arith.mulf %243, %247 : vector<2x32xf32>
    %c5_i32 = arith.constant 5 : i32
    %249 = arith.index_cast %c5_i32 : i32 to index
    %c0_102 = arith.constant 0 : index
    %c0_103 = arith.constant 0 : index
    %250 = vector.load %arg2[%249, %c0_102, %c0_103] : memref<8x2x4xf32, #tpu.memory_space<vmem>>, vector<1x2x4xf32>
    %251 = vector.shape_cast %250 : vector<1x2x4xf32> to vector<2x4xf32>
    %cst_104 = arith.constant dense<0.000000e+00> : vector<2x32xf32>
    %252 = tpu.matmul %251, %4, %cst_104 {dimension_numbers = #tpu.dot_dimension_numbers<[1], [0], [0], [1], [0, 0, 1, 1], [], []>} : vector<2x4xf32>, vector<4x32xf32>, vector<2x32xf32> -> vector<2x32xf32>
    %cst_105 = arith.constant dense<0.000000e+00> : vector<2x32xf32>
    %253 = tpu.matmul %248, %12, %cst_105 {dimension_numbers = #tpu.dot_dimension_numbers<[1], [0], [0], [1], [0, 0, 1, 1], [], []>} : vector<2x32xf32>, vector<32x32xf32>, vector<2x32xf32> -> vector<2x32xf32>
    %254 = arith.addf %252, %253 : vector<2x32xf32>
    %255 = vector.broadcast %20 : vector<1x32xf32> to vector<2x32xf32>
    %256 = arith.addf %254, %255 : vector<2x32xf32>
    %cst_106 = arith.constant dense<0.000000e+00> : vector<2x32xf32>
    %257 = tpu.matmul %251, %6, %cst_106 {dimension_numbers = #tpu.dot_dimension_numbers<[1], [0], [0], [1], [0, 0, 1, 1], [], []>} : vector<2x4xf32>, vector<4x32xf32>, vector<2x32xf32> -> vector<2x32xf32>
    %cst_107 = arith.constant dense<0.000000e+00> : vector<2x32xf32>
    %258 = tpu.matmul %248, %14, %cst_107 {dimension_numbers = #tpu.dot_dimension_numbers<[1], [0], [0], [1], [0, 0, 1, 1], [], []>} : vector<2x32xf32>, vector<32x32xf32>, vector<2x32xf32> -> vector<2x32xf32>
    %259 = arith.addf %257, %258 : vector<2x32xf32>
    %260 = vector.broadcast %22 : vector<1x32xf32> to vector<2x32xf32>
    %261 = arith.addf %259, %260 : vector<2x32xf32>
    %cst_108 = arith.constant dense<0.000000e+00> : vector<2x32xf32>
    %262 = tpu.matmul %251, %8, %cst_108 {dimension_numbers = #tpu.dot_dimension_numbers<[1], [0], [0], [1], [0, 0, 1, 1], [], []>} : vector<2x4xf32>, vector<4x32xf32>, vector<2x32xf32> -> vector<2x32xf32>
    %cst_109 = arith.constant dense<0.000000e+00> : vector<2x32xf32>
    %263 = tpu.matmul %248, %16, %cst_109 {dimension_numbers = #tpu.dot_dimension_numbers<[1], [0], [0], [1], [0, 0, 1, 1], [], []>} : vector<2x32xf32>, vector<32x32xf32>, vector<2x32xf32> -> vector<2x32xf32>
    %264 = arith.addf %262, %263 : vector<2x32xf32>
    %265 = vector.broadcast %24 : vector<1x32xf32> to vector<2x32xf32>
    %266 = arith.addf %264, %265 : vector<2x32xf32>
    %cst_110 = arith.constant dense<0.000000e+00> : vector<2x32xf32>
    %267 = tpu.matmul %251, %10, %cst_110 {dimension_numbers = #tpu.dot_dimension_numbers<[1], [0], [0], [1], [0, 0, 1, 1], [], []>} : vector<2x4xf32>, vector<4x32xf32>, vector<2x32xf32> -> vector<2x32xf32>
    %cst_111 = arith.constant dense<0.000000e+00> : vector<2x32xf32>
    %268 = tpu.matmul %248, %18, %cst_111 {dimension_numbers = #tpu.dot_dimension_numbers<[1], [0], [0], [1], [0, 0, 1, 1], [], []>} : vector<2x32xf32>, vector<32x32xf32>, vector<2x32xf32> -> vector<2x32xf32>
    %269 = arith.addf %267, %268 : vector<2x32xf32>
    %270 = vector.broadcast %26 : vector<1x32xf32> to vector<2x32xf32>
    %271 = arith.addf %269, %270 : vector<2x32xf32>
    %272 = arith.negf %256 : vector<2x32xf32>
    %273 = math.exp %272 : vector<2x32xf32>
    %cst_112 = arith.constant 1.000000e+00 : f32
    %274 = vector.broadcast %cst_112 : f32 to vector<2x32xf32>
    %275 = arith.addf %274, %273 : vector<2x32xf32>
    %276 = arith.divf %274, %275 : vector<2x32xf32>
    %277 = arith.negf %261 : vector<2x32xf32>
    %278 = math.exp %277 : vector<2x32xf32>
    %cst_113 = arith.constant 1.000000e+00 : f32
    %279 = vector.broadcast %cst_113 : f32 to vector<2x32xf32>
    %280 = arith.addf %279, %278 : vector<2x32xf32>
    %281 = arith.divf %279, %280 : vector<2x32xf32>
    %282 = math.tanh %266 : vector<2x32xf32>
    %283 = arith.negf %271 : vector<2x32xf32>
    %284 = math.exp %283 : vector<2x32xf32>
    %cst_114 = arith.constant 1.000000e+00 : f32
    %285 = vector.broadcast %cst_114 : f32 to vector<2x32xf32>
    %286 = arith.addf %285, %284 : vector<2x32xf32>
    %287 = arith.divf %285, %286 : vector<2x32xf32>
    %288 = arith.mulf %281, %246 : vector<2x32xf32>
    %289 = arith.mulf %276, %282 : vector<2x32xf32>
    %290 = arith.addf %288, %289 : vector<2x32xf32>
    %291 = math.tanh %290 : vector<2x32xf32>
    %292 = arith.mulf %287, %291 : vector<2x32xf32>
    %c6_i32 = arith.constant 6 : i32
    %293 = arith.index_cast %c6_i32 : i32 to index
    %c0_115 = arith.constant 0 : index
    %c0_116 = arith.constant 0 : index
    %294 = vector.load %arg2[%293, %c0_115, %c0_116] : memref<8x2x4xf32, #tpu.memory_space<vmem>>, vector<1x2x4xf32>
    %295 = vector.shape_cast %294 : vector<1x2x4xf32> to vector<2x4xf32>
    %cst_117 = arith.constant dense<0.000000e+00> : vector<2x32xf32>
    %296 = tpu.matmul %295, %4, %cst_117 {dimension_numbers = #tpu.dot_dimension_numbers<[1], [0], [0], [1], [0, 0, 1, 1], [], []>} : vector<2x4xf32>, vector<4x32xf32>, vector<2x32xf32> -> vector<2x32xf32>
    %cst_118 = arith.constant dense<0.000000e+00> : vector<2x32xf32>
    %297 = tpu.matmul %292, %12, %cst_118 {dimension_numbers = #tpu.dot_dimension_numbers<[1], [0], [0], [1], [0, 0, 1, 1], [], []>} : vector<2x32xf32>, vector<32x32xf32>, vector<2x32xf32> -> vector<2x32xf32>
    %298 = arith.addf %296, %297 : vector<2x32xf32>
    %299 = vector.broadcast %20 : vector<1x32xf32> to vector<2x32xf32>
    %300 = arith.addf %298, %299 : vector<2x32xf32>
    %cst_119 = arith.constant dense<0.000000e+00> : vector<2x32xf32>
    %301 = tpu.matmul %295, %6, %cst_119 {dimension_numbers = #tpu.dot_dimension_numbers<[1], [0], [0], [1], [0, 0, 1, 1], [], []>} : vector<2x4xf32>, vector<4x32xf32>, vector<2x32xf32> -> vector<2x32xf32>
    %cst_120 = arith.constant dense<0.000000e+00> : vector<2x32xf32>
    %302 = tpu.matmul %292, %14, %cst_120 {dimension_numbers = #tpu.dot_dimension_numbers<[1], [0], [0], [1], [0, 0, 1, 1], [], []>} : vector<2x32xf32>, vector<32x32xf32>, vector<2x32xf32> -> vector<2x32xf32>
    %303 = arith.addf %301, %302 : vector<2x32xf32>
    %304 = vector.broadcast %22 : vector<1x32xf32> to vector<2x32xf32>
    %305 = arith.addf %303, %304 : vector<2x32xf32>
    %cst_121 = arith.constant dense<0.000000e+00> : vector<2x32xf32>
    %306 = tpu.matmul %295, %8, %cst_121 {dimension_numbers = #tpu.dot_dimension_numbers<[1], [0], [0], [1], [0, 0, 1, 1], [], []>} : vector<2x4xf32>, vector<4x32xf32>, vector<2x32xf32> -> vector<2x32xf32>
    %cst_122 = arith.constant dense<0.000000e+00> : vector<2x32xf32>
    %307 = tpu.matmul %292, %16, %cst_122 {dimension_numbers = #tpu.dot_dimension_numbers<[1], [0], [0], [1], [0, 0, 1, 1], [], []>} : vector<2x32xf32>, vector<32x32xf32>, vector<2x32xf32> -> vector<2x32xf32>
    %308 = arith.addf %306, %307 : vector<2x32xf32>
    %309 = vector.broadcast %24 : vector<1x32xf32> to vector<2x32xf32>
    %310 = arith.addf %308, %309 : vector<2x32xf32>
    %cst_123 = arith.constant dense<0.000000e+00> : vector<2x32xf32>
    %311 = tpu.matmul %295, %10, %cst_123 {dimension_numbers = #tpu.dot_dimension_numbers<[1], [0], [0], [1], [0, 0, 1, 1], [], []>} : vector<2x4xf32>, vector<4x32xf32>, vector<2x32xf32> -> vector<2x32xf32>
    %cst_124 = arith.constant dense<0.000000e+00> : vector<2x32xf32>
    %312 = tpu.matmul %292, %18, %cst_124 {dimension_numbers = #tpu.dot_dimension_numbers<[1], [0], [0], [1], [0, 0, 1, 1], [], []>} : vector<2x32xf32>, vector<32x32xf32>, vector<2x32xf32> -> vector<2x32xf32>
    %313 = arith.addf %311, %312 : vector<2x32xf32>
    %314 = vector.broadcast %26 : vector<1x32xf32> to vector<2x32xf32>
    %315 = arith.addf %313, %314 : vector<2x32xf32>
    %316 = arith.negf %300 : vector<2x32xf32>
    %317 = math.exp %316 : vector<2x32xf32>
    %cst_125 = arith.constant 1.000000e+00 : f32
    %318 = vector.broadcast %cst_125 : f32 to vector<2x32xf32>
    %319 = arith.addf %318, %317 : vector<2x32xf32>
    %320 = arith.divf %318, %319 : vector<2x32xf32>
    %321 = arith.negf %305 : vector<2x32xf32>
    %322 = math.exp %321 : vector<2x32xf32>
    %cst_126 = arith.constant 1.000000e+00 : f32
    %323 = vector.broadcast %cst_126 : f32 to vector<2x32xf32>
    %324 = arith.addf %323, %322 : vector<2x32xf32>
    %325 = arith.divf %323, %324 : vector<2x32xf32>
    %326 = math.tanh %310 : vector<2x32xf32>
    %327 = arith.negf %315 : vector<2x32xf32>
    %328 = math.exp %327 : vector<2x32xf32>
    %cst_127 = arith.constant 1.000000e+00 : f32
    %329 = vector.broadcast %cst_127 : f32 to vector<2x32xf32>
    %330 = arith.addf %329, %328 : vector<2x32xf32>
    %331 = arith.divf %329, %330 : vector<2x32xf32>
    %332 = arith.mulf %325, %290 : vector<2x32xf32>
    %333 = arith.mulf %320, %326 : vector<2x32xf32>
    %334 = arith.addf %332, %333 : vector<2x32xf32>
    %335 = math.tanh %334 : vector<2x32xf32>
    %336 = arith.mulf %331, %335 : vector<2x32xf32>
    %c7_i32 = arith.constant 7 : i32
    %337 = arith.index_cast %c7_i32 : i32 to index
    %c0_128 = arith.constant 0 : index
    %c0_129 = arith.constant 0 : index
    %338 = vector.load %arg2[%337, %c0_128, %c0_129] : memref<8x2x4xf32, #tpu.memory_space<vmem>>, vector<1x2x4xf32>
    %339 = vector.shape_cast %338 : vector<1x2x4xf32> to vector<2x4xf32>
    %cst_130 = arith.constant dense<0.000000e+00> : vector<2x32xf32>
    %340 = tpu.matmul %339, %4, %cst_130 {dimension_numbers = #tpu.dot_dimension_numbers<[1], [0], [0], [1], [0, 0, 1, 1], [], []>} : vector<2x4xf32>, vector<4x32xf32>, vector<2x32xf32> -> vector<2x32xf32>
    %cst_131 = arith.constant dense<0.000000e+00> : vector<2x32xf32>
    %341 = tpu.matmul %336, %12, %cst_131 {dimension_numbers = #tpu.dot_dimension_numbers<[1], [0], [0], [1], [0, 0, 1, 1], [], []>} : vector<2x32xf32>, vector<32x32xf32>, vector<2x32xf32> -> vector<2x32xf32>
    %342 = arith.addf %340, %341 : vector<2x32xf32>
    %343 = vector.broadcast %20 : vector<1x32xf32> to vector<2x32xf32>
    %344 = arith.addf %342, %343 : vector<2x32xf32>
    %cst_132 = arith.constant dense<0.000000e+00> : vector<2x32xf32>
    %345 = tpu.matmul %339, %6, %cst_132 {dimension_numbers = #tpu.dot_dimension_numbers<[1], [0], [0], [1], [0, 0, 1, 1], [], []>} : vector<2x4xf32>, vector<4x32xf32>, vector<2x32xf32> -> vector<2x32xf32>
    %cst_133 = arith.constant dense<0.000000e+00> : vector<2x32xf32>
    %346 = tpu.matmul %336, %14, %cst_133 {dimension_numbers = #tpu.dot_dimension_numbers<[1], [0], [0], [1], [0, 0, 1, 1], [], []>} : vector<2x32xf32>, vector<32x32xf32>, vector<2x32xf32> -> vector<2x32xf32>
    %347 = arith.addf %345, %346 : vector<2x32xf32>
    %348 = vector.broadcast %22 : vector<1x32xf32> to vector<2x32xf32>
    %349 = arith.addf %347, %348 : vector<2x32xf32>
    %cst_134 = arith.constant dense<0.000000e+00> : vector<2x32xf32>
    %350 = tpu.matmul %339, %8, %cst_134 {dimension_numbers = #tpu.dot_dimension_numbers<[1], [0], [0], [1], [0, 0, 1, 1], [], []>} : vector<2x4xf32>, vector<4x32xf32>, vector<2x32xf32> -> vector<2x32xf32>
    %cst_135 = arith.constant dense<0.000000e+00> : vector<2x32xf32>
    %351 = tpu.matmul %336, %16, %cst_135 {dimension_numbers = #tpu.dot_dimension_numbers<[1], [0], [0], [1], [0, 0, 1, 1], [], []>} : vector<2x32xf32>, vector<32x32xf32>, vector<2x32xf32> -> vector<2x32xf32>
    %352 = arith.addf %350, %351 : vector<2x32xf32>
    %353 = vector.broadcast %24 : vector<1x32xf32> to vector<2x32xf32>
    %354 = arith.addf %352, %353 : vector<2x32xf32>
    %cst_136 = arith.constant dense<0.000000e+00> : vector<2x32xf32>
    %355 = tpu.matmul %339, %10, %cst_136 {dimension_numbers = #tpu.dot_dimension_numbers<[1], [0], [0], [1], [0, 0, 1, 1], [], []>} : vector<2x4xf32>, vector<4x32xf32>, vector<2x32xf32> -> vector<2x32xf32>
    %cst_137 = arith.constant dense<0.000000e+00> : vector<2x32xf32>
    %356 = tpu.matmul %336, %18, %cst_137 {dimension_numbers = #tpu.dot_dimension_numbers<[1], [0], [0], [1], [0, 0, 1, 1], [], []>} : vector<2x32xf32>, vector<32x32xf32>, vector<2x32xf32> -> vector<2x32xf32>
    %357 = arith.addf %355, %356 : vector<2x32xf32>
    %358 = vector.broadcast %26 : vector<1x32xf32> to vector<2x32xf32>
    %359 = arith.addf %357, %358 : vector<2x32xf32>
    %360 = arith.negf %344 : vector<2x32xf32>
    %361 = math.exp %360 : vector<2x32xf32>
    %cst_138 = arith.constant 1.000000e+00 : f32
    %362 = vector.broadcast %cst_138 : f32 to vector<2x32xf32>
    %363 = arith.addf %362, %361 : vector<2x32xf32>
    %364 = arith.divf %362, %363 : vector<2x32xf32>
    %365 = arith.negf %349 : vector<2x32xf32>
    %366 = math.exp %365 : vector<2x32xf32>
    %cst_139 = arith.constant 1.000000e+00 : f32
    %367 = vector.broadcast %cst_139 : f32 to vector<2x32xf32>
    %368 = arith.addf %367, %366 : vector<2x32xf32>
    %369 = arith.divf %367, %368 : vector<2x32xf32>
    %370 = math.tanh %354 : vector<2x32xf32>
    %371 = arith.negf %359 : vector<2x32xf32>
    %372 = math.exp %371 : vector<2x32xf32>
    %cst_140 = arith.constant 1.000000e+00 : f32
    %373 = vector.broadcast %cst_140 : f32 to vector<2x32xf32>
    %374 = arith.addf %373, %372 : vector<2x32xf32>
    %375 = arith.divf %373, %374 : vector<2x32xf32>
    %376 = arith.mulf %369, %334 : vector<2x32xf32>
    %377 = arith.mulf %364, %370 : vector<2x32xf32>
    %378 = arith.addf %376, %377 : vector<2x32xf32>
    %379 = math.tanh %378 : vector<2x32xf32>
    %380 = arith.mulf %375, %379 : vector<2x32xf32>
    %c8_i32 = arith.constant 8 : i32
    %c0_141 = arith.constant 0 : index
    %c0_142 = arith.constant 0 : index
    %381 = vector.load %arg11[%c0_141, %c0_142] : memref<2x32xf32, #tpu.memory_space<vmem>>, vector<2x32xf32>
    tpu.vector_store %arg11[%c0_141, %c0_142], %380 {strides = array<i32>} : memref<2x32xf32, #tpu.memory_space<vmem>>, vector<2x32xf32>,
    %c0_143 = arith.constant 0 : index
    %c0_144 = arith.constant 0 : index
    %382 = vector.load %arg12[%c0_143, %c0_144] : memref<2x32xf32, #tpu.memory_space<vmem>>, vector<2x32xf32>
    tpu.vector_store %arg12[%c0_143, %c0_144], %378 {strides = array<i32>} : memref<2x32xf32, #tpu.memory_space<vmem>>, vector<2x32xf32>,
    %c0_i32_145 = arith.constant 0 : i32
    %383 = arith.cmpi eq, %arg1, %c0_i32_145 : i32
    %384 = arith.extui %383 : i1 to i32
    %c0_i32_146 = arith.constant 0 : i32
    %385 = arith.cmpi ne, %384, %c0_i32_146 : i32
    scf.if %385 {
      %c0_147 = arith.constant 0 : index
      %c0_148 = arith.constant 0 : index
      %386 = vector.load %arg7[%c0_147, %c0_148] : memref<32x4xf32, #tpu.memory_space<vmem>>, vector<32x4xf32>
      %cst_149 = arith.constant dense<0.000000e+00> : vector<2x4xf32>
      %387 = tpu.matmul %380, %386, %cst_149 {dimension_numbers = #tpu.dot_dimension_numbers<[1], [0], [0], [1], [0, 0, 1, 1], [], []>} : vector<2x32xf32>, vector<32x4xf32>, vector<2x4xf32> -> vector<2x4xf32>
      %c0_150 = arith.constant 0 : index
      %c0_151 = arith.constant 0 : index
      %388 = vector.load %arg9[%c0_150, %c0_151] : memref<1x4xf32, #tpu.memory_space<vmem>>, vector<1x4xf32>
      %389 = vector.broadcast %388 : vector<1x4xf32> to vector<2x4xf32>
      %390 = arith.addf %387, %389 : vector<2x4xf32>
      %c0_152 = arith.constant 0 : index
      %c0_153 = arith.constant 0 : index
      %391 = vector.load %arg6[%c0_152, %c0_153] : memref<2x1xf32, #tpu.memory_space<vmem>>, vector<2x1xf32>
      %c0_154 = arith.constant 0 : index
      %c0_155 = arith.constant 0 : index
      %392 = vector.load %arg8[%c0_154, %c0_155] : memref<1x4xf32, #tpu.memory_space<vmem>>, vector<1x4xf32>
      %393 = vector.broadcast %391 : vector<2x1xf32> to vector<2x4xf32>
      %394 = vector.broadcast %392 : vector<1x4xf32> to vector<2x4xf32>
      %395 = arith.mulf %393, %394 : vector<2x4xf32>
      %396 = arith.addf %390, %395 : vector<2x4xf32>
      %c0_156 = arith.constant 0 : index
      %c0_157 = arith.constant 0 : index
      %397 = vector.load %arg10[%c0_156, %c0_157] : memref<2x8xf32, #tpu.memory_space<vmem>>, vector<2x4xf32>
      tpu.vector_store %arg10[%c0_156, %c0_157], %396 {strides = array<i32>} : memref<2x8xf32, #tpu.memory_space<vmem>>, vector<2x4xf32>,
      %c0_158 = arith.constant 0 : index
      %c0_159 = arith.constant 0 : index
      %398 = vector.load %arg8[%c0_158, %c0_159] : memref<1x4xf32, #tpu.memory_space<vmem>>, vector<1x4xf32>
      %399 = vector.broadcast %398 : vector<1x4xf32> to vector<2x4xf32>
      %400 = arith.subf %399, %395 : vector<2x4xf32>
      %401 = arith.addf %390, %400 : vector<2x4xf32>
      %c0_160 = arith.constant 0 : index
      %c4 = arith.constant 4 : index
      %402 = vector.load %arg10[%c0_160, %c4] : memref<2x8xf32, #tpu.memory_space<vmem>>, vector<2x4xf32>
      tpu.vector_store %arg10[%c0_160, %c4], %401 {strides = array<i32>} : memref<2x8xf32, #tpu.memory_space<vmem>>, vector<2x4xf32>,
    } else {
    }
    return
  }
  func.func @transform_0(%arg0: i32, %arg1: i32) -> (i32, i32, i32) {
    %c0_i32 = arith.constant 0 : i32
    %c0_i32_0 = arith.constant 0 : i32
    return %arg1, %arg0, %c0_i32 : i32, i32, i32
  }
  func.func @transform_1(%arg0: i32, %arg1: i32) -> (i32, i32, i32) {
    %c0_i32 = arith.constant 0 : i32
    %c0_i32_0 = arith.constant 0 : i32
    %c0_i32_1 = arith.constant 0 : i32
    %c0_i32_2 = arith.constant 0 : i32
    return %c0_i32, %c0_i32_0, %c0_i32_1 : i32, i32, i32
  }
  func.func @transform_2(%arg0: i32, %arg1: i32) -> (i32, i32, i32) {
    %c0_i32 = arith.constant 0 : i32
    %c0_i32_0 = arith.constant 0 : i32
    %c0_i32_1 = arith.constant 0 : i32
    %c0_i32_2 = arith.constant 0 : i32
    return %c0_i32, %c0_i32_0, %c0_i32_1 : i32, i32, i32
  }
  func.func @transform_3(%arg0: i32, %arg1: i32) -> (i32, i32, i32) {
    %c0_i32 = arith.constant 0 : i32
    %c0_i32_0 = arith.constant 0 : i32
    %c0_i32_1 = arith.constant 0 : i32
    %c0_i32_2 = arith.constant 0 : i32
    return %c0_i32, %c0_i32_0, %c0_i32_1 : i32, i32, i32
  }
  func.func @transform_4(%arg0: i32, %arg1: i32) -> (i32, i32) {
    %c0_i32 = arith.constant 0 : i32
    %c0_i32_0 = arith.constant 0 : i32
    return %arg0, %c0_i32 : i32, i32
  }
  func.func @transform_5(%arg0: i32, %arg1: i32) -> (i32, i32) {
    %c0_i32 = arith.constant 0 : i32
    %c0_i32_0 = arith.constant 0 : i32
    %c0_i32_1 = arith.constant 0 : i32
    return %c0_i32, %c0_i32_0 : i32, i32
  }
  func.func @transform_6(%arg0: i32, %arg1: i32) -> (i32, i32) {
    %c0_i32 = arith.constant 0 : i32
    %c0_i32_0 = arith.constant 0 : i32
    %c0_i32_1 = arith.constant 0 : i32
    return %c0_i32, %c0_i32_0 : i32, i32
  }
  func.func @transform_7(%arg0: i32, %arg1: i32) -> (i32, i32) {
    %c0_i32 = arith.constant 0 : i32
    %c0_i32_0 = arith.constant 0 : i32
    %c0_i32_1 = arith.constant 0 : i32
    return %c0_i32, %c0_i32_0 : i32, i32
  }
  func.func @transform_8(%arg0: i32, %arg1: i32) -> (i32, i32) {
    %c0_i32 = arith.constant 0 : i32
    %c0_i32_0 = arith.constant 0 : i32
    return %arg0, %c0_i32 : i32, i32
  }
}

</mosaic_0001>

<bundles_post_ra>
// kernel: tpu_custom_call.1
= control target key start
LH: loop header
LB: loop body
LE: loop exit
PB: predicated region body
PF: predicated region fallthrough
CT: control target
= control target key end

     0   :  { %13 = vsyncpa [#allocation5], 0  ;;  %s7034_s0 = inlined_call_operand.vmem [shape: f32[8,2,4], index: 0, kind: input, shape index: {}]   ;;  %s7035_s1 = inlined_call_operand.vmem [shape: f32[4,4,32], index: 1, kind: input, shape index: {}]   ;;  %s7036_s2 = inlined_call_operand.hbm [shape: f32[4,32,32], index: 2, kind: input, shape index: {}]   ;;  %s7037_s3 = inlined_call_operand.vmem [shape: f32[4,1,32], index: 3, kind: input, shape index: {}]   ;;  %s7038_s4 = inlined_call_operand.vmem [shape: f32[2,1], index: 4, kind: input, shape index: {}]   ;;  %s7039_s5 = inlined_call_operand.vmem [shape: f32[32,4], index: 5, kind: input, shape index: {}]   ;;  %s7040_s6 = inlined_call_operand.vmem [shape: f32[1,4], index: 6, kind: input, shape index: {}]   ;;  %s7041_s7 = inlined_call_operand.vmem [shape: f32[1,4], index: 7, kind: input, shape index: {}]   ;;  %s7042_s8 = inlined_call_operand.hbm [shape: f32[2,8], index: 8, kind: output, shape index: {}]  }
   0x1   :  { %14 = vsyncpa [#allocation6], 0  ;;  %s6127_s27 = smov [#allocation4]  }
   0x2   :  { %s24_s28 = sshll.u32 %s6127_s27, 4  ;;  %s25_s28 = int_to_ptr.vmem [resolvable:$true] %s24_s28 }
   0x3   :  { %s6091_s29 = scalar_lea.vmem %s25_s28, 2048  ;;  %p6096_p1 = scmp.lt.s32.totalorder %s25_s28, %s25_s28 }
   0x4   :  { %p6092_p0 = scmp.ne.s32.totalorder %s25_s28, %s6091_s29  ;;  %p6097_p2 = scmp.lt.s32.totalorder %s6091_s29, %s6091_s29 }
   0x6   :  { %p6098_p3 = por %p6097_p2, %p6096_p1 }
   0x8   :  { %p6099_p4 = pnand %p6098_p3, %p6092_p0 }
   0xa   :  { %6102 = shalt.err (!%p6099_p4)
}
   0xb   :  { %s6128_s30 = smov 128   ;;  %s6129_s9 = smov 8  }
   0xc   :  { %30 = dma.hbm_to_vmem [thread:$0]  %s7036_s2, 2048, %s25_s28, [#allocation5], %s6128_s30, %s6128_s30, %s6129_s9  }
   0xd   :  { %6123 = dma.done.wait [#allocation5], 2048  }
   0xe   :  { %6124 = vsyncadd [#allocation5], 4294965248  ;;  %vm48_vm0 = vcmask 254976   ;;  %v6130_v0 = vmov 0.0   ;;  %vm6131_vm1 = vmmov 0   ;;  %v6193_v1 = vld [vmem:[#allocation4 + $0x18] sm:$0xff] }
   0xf   :  { %5399 = vmatprep.subr.mxu0 %v6130_v0  ;;  %5407 = vmatprep.mubr.msk.f32.mxu0 %vm6131_vm1, %v6130_v0  ;;  %49 = vst.msk [vmem:[#allocation2] sm:$0x3] %vm48_vm0, %v6130_v0  ;;  %50 = vst.msk [vmem:[#allocation3] sm:$0x3] %vm48_vm0, %v6130_v0  ;;  %v6195_v2 = vld [vmem:[#allocation4 + $0x10] sm:$0xff]  ;;  %v6198_v3 = vld [vmem:[#allocation4 + $0x38] sm:$0xff] }
  0x10   :  { %5415 = vmatprep.subr.mxu1 %v6130_v0  ;;  %5423 = vmatprep.mubr.msk.f32.mxu1 %vm6131_vm1, %v6130_v0  ;;  %v6201_v4 = vld [vmem:[#allocation4 + $0x8] sm:$0xff]  ;;  %v6204_v5 = vld [vmem:[#allocation4 + $0x30] sm:$0xff]  ;;  %v6211_v7 = vld [vmem:[#allocation4] sm:$0xff]  ;;  %vm87_vm2 = vcmask 261120   ;;  %vm165_vm3 = vcmask 1043456   ;;  %vm161_vm4 = vcmask 31744  }
  0x11   :  { %5400 = vmatpush3.msra.mxu0 %v6193_v1  ;;  %5416 = vmatpush3.msra.mxu1 %v6198_v3  ;;  %v6208_v6 = vld [vmem:[#allocation4 + $0x28] sm:$0xff]  ;;  %v6220_v9 = vld [vmem:[%s7035_s1] sm:$0xf]  ;;  %v6225_v10 = vld [vmem:[#allocation4 + $0x20] sm:$0xff]  ;;  %vm4997_vm5 = vcmask 25600   ;;  %s6133_s22 = smov 4  }
  0x12   :  { %5401 = vmatprep.subr.mxu0 %v6130_v0  ;;  %5417 = vmatprep.subr.mxu1 %v6130_v0  ;;  %v86_v11 = vld [vmem:[%s7034_s0] sm:$0x3]  ;;  %v6242_v13 = vld [vmem:[%s7035_s1 + $0x4] sm:$0xf]  ;;  %v6249_v14 = vld [vmem:[#allocation4 + $0x50] sm:$0xff]  ;;  %s6134_s23 = smov [#allocation7]  }
  0x13   :  { %5402 = vmatpush3.msra.mxu0 %v6195_v2  ;;  %5418 = vmatpush3.msra.mxu1 %v6204_v5  ;;  %v6236_v12 = vld [vmem:[#allocation4 + $0x58] sm:$0xff]  ;;  %v6260_v15 = vld [vmem:[%s7035_s1 + $0x8] sm:$0xf]  ;;  %v6262_v16 = vld [vmem:[#allocation4 + $0x48] sm:$0xff]  ;;  %vm5012_vm6 = vcmask 58400  }
  0x14   :  { %5403 = vmatprep.subr.mxu0 %v6130_v0  ;;  %5419 = vmatprep.subr.mxu1 %v6130_v0  ;;  %v6272_v17 = vld [vmem:[#allocation4 + $0x40] sm:$0xff]  ;;  %v6277_v18 = vld [vmem:[#allocation4 + $0x78] sm:$0xff]  ;;  %v6282_v19 = vld [vmem:[#allocation4 + $0x70] sm:$0xff] }
  0x15   :  { %5404 = vmatpush3.msra.mxu0 %v6201_v4  ;;  %5420 = vmatpush3.msra.mxu1 %v6208_v6  ;;  %v6287_v20 = vld [vmem:[%s7035_s1 + $0xc] sm:$0xf]  ;;  %v6299_v22 = vld [vmem:[#allocation4 + $0x60] sm:$0xff]  ;;  %v6330_v23 = vld [vmem:[%s7034_s0 + $0x2] sm:$0x3] }
  0x16   :  { %v84_v8 = vld [vmem:[#allocation2] sm:$0x3]  ;;  %5405 = vmatprep.subr.mxu0 %v6130_v0  ;;  %5421 = vmatprep.subr.mxu1 %v6130_v0  ;;  %v6292_v21 = vld [vmem:[#allocation4 + $0x68] sm:$0xff]  ;;  %v6359_v46 = vld [vmem:[%s7037_s3 + $0x3] ss:$0 sm:$0xff] }
  0x17   :  { %5406 = vmatpush3.msra.mxu0 %v6211_v7  ;;  %5422 = vmatpush3.msra.mxu1 %v6225_v10  ;;  %v6347_v27 = vld [vmem:[%s7037_s3] ss:$0 sm:$0xff]  ;;  %v6353_v33 = vld [vmem:[%s7037_s3 + $0x1] ss:$0 sm:$0xff]  ;;  %v6364_v51 = vld [vmem:[%s7037_s3 + $0x2] ss:$0 sm:$0xff] }
  0x18   :  { %5408 = vmatmul.mubr.msk.f32.vlgmr.msra.gmra.mxu0 %vm87_vm2, %v84_v8  ;;  %5410 = vmatprep.subr.mxu0 %v6130_v0  ;;  %v85_v61 = vld [vmem:[#allocation3] sm:$0x3] }
  0x19   :  { %5411 = vmatpush3.msk.msra.mxu0 %vm165_vm3, %v6220_v9  ;;  %5412 = vmatprep.mubr.msk.f32.mxu0 %vm6131_vm1, %v6130_v0 }
  0x1a   :  { %5426 = vmatprep.subr.mxu0 %v6130_v0  ;;  %5424 = vmatmul.mubr.msk.f32.vlgmr.msra.gmra.mxu1 %vm87_vm2, %v84_v8 }
  0x1b   :  { %5431 = vmatprep.subr.mxu1 %v6130_v0  ;;  %5439 = vmatprep.mubr.msk.f32.mxu1 %vm6131_vm1, %v6130_v0 }
  0x1c   :  { %5413 = vmatmul.mubr.msk.f32.vlgmr.msra.gmra.mxu0 %vm161_vm4, %v86_v11  ;;  %5432 = vmatpush3.msra.mxu1 %v6236_v12 }
  0x1d   :  { %5427 = vmatpush3.msk.msra.mxu0 %vm165_vm3, %v6242_v13  ;;  %5428 = vmatprep.mubr.msk.f32.mxu0 %vm6131_vm1, %v6130_v0 }
  0x1e   :  { %5433 = vmatprep.subr.mxu1 %v6130_v0  ;;  %5442 = vmatprep.subr.mxu0 %v6130_v0 }
  0x1f   :  { %5434 = vmatpush3.msra.mxu1 %v6249_v14 }
  0x20   :  { %5429 = vmatmul.mubr.msk.f32.vlgmr.msra.gmra.mxu0 %vm161_vm4, %v86_v11  ;;  %5435 = vmatprep.subr.mxu1 %v6130_v0 }
  0x21   :  { %5443 = vmatpush3.msk.msra.mxu0 %vm165_vm3, %v6260_v15  ;;  %5436 = vmatpush3.msra.mxu1 %v6262_v16 }
  0x22   :  { %5444 = vmatprep.mubr.msk.f32.mxu0 %vm6131_vm1, %v6130_v0  ;;  %5447 = vmatprep.subr.mxu0 %v6130_v0 }
  0x23   :  { %5437 = vmatprep.subr.mxu1 %v6130_v0 }
  0x24   :  { %5445 = vmatmul.mubr.msk.f32.vlgmr.msra.gmra.mxu0 %vm161_vm4, %v86_v11  ;;  %5438 = vmatpush3.msra.mxu1 %v6272_v17 }
  0x25   :  { %5448 = vmatpush3.msra.mxu0 %v6277_v18  ;;  %5440 = vmatmul.mubr.msk.f32.vlgmr.msra.gmra.mxu1 %vm87_vm2, %v84_v8 }
  0x26   :  { %5449 = vmatprep.subr.mxu0 %v6130_v0  ;;  %5458 = vmatprep.subr.mxu1 %v6130_v0 }
  0x27   :  { %5450 = vmatpush3.msra.mxu0 %v6282_v19  ;;  %5459 = vmatpush3.msk.msra.mxu1 %vm165_vm3, %v6287_v20 }
  0x28   :  { %5451 = vmatprep.subr.mxu0 %v6130_v0  ;;  %5455 = vmatprep.mubr.msk.f32.mxu0 %vm6131_vm1, %v6130_v0 }
  0x29   :  { %5452 = vmatpush3.msra.mxu0 %v6292_v21  ;;  %5460 = vmatprep.mubr.msk.f32.mxu1 %vm6131_vm1, %v6130_v0 }
  0x2a   :  { %5453 = vmatprep.subr.mxu0 %v6130_v0  ;;  %5461 = vmatmul.mubr.msk.f32.vlgmr.msra.gmra.mxu1 %vm161_vm4, %v86_v11 }
  0x2b   :  { %5454 = vmatpush3.msra.mxu0 %v6299_v22  ;;  %5463 = vmatprep.subr.mxu1 %v6130_v0 }
  0x2c   :  { %5456 = vmatmul.mubr.msk.f32.vlgmr.msra.gmra.mxu0 %vm87_vm2, %v84_v8  ;;  %5474 = vmatprep.subr.mxu0 %v6130_v0 }
  0x2d   :  { %5475 = vmatpush3.msk.msra.mxu0 %vm165_vm3, %v6220_v9  ;;  %5476 = vmatprep.mubr.msk.f32.mxu0 %vm6131_vm1, %v6130_v0 }
  0x2e   :  { %5479 = vmatprep.subr.mxu0 %v6130_v0  ;;  %5464 = vmatpush3.msra.mxu1 %v6193_v1 }
  0x2f   :  { %5465 = vmatprep.subr.mxu1 %v6130_v0  ;;  %5471 = vmatprep.mubr.msk.f32.mxu1 %vm6131_vm1, %v6130_v0 }
  0x30   :  { %5466 = vmatpush3.msra.mxu1 %v6195_v2  ;;  %5477 = vmatmul.mubr.msk.f32.vlgmr.msra.gmra.mxu0 %vm161_vm4, %v6330_v23 }
  0x31   :  { %5467 = vmatprep.subr.mxu1 %v6130_v0  ;;  %5480 = vmatpush3.msra.mxu0 %v6198_v3 }
  0x32   :  { %5468 = vmatpush3.msra.mxu1 %v6201_v4  ;;  %5487 = vmatprep.mubr.msk.f32.mxu0 %vm6131_vm1, %v6130_v0 }
  0x33   :  { %5469 = vmatprep.subr.mxu1 %v6130_v0  ;;  %5481 = vmatprep.subr.mxu0 %v6130_v0 }
  0x34   :  { %5470 = vmatpush3.msra.mxu1 %v6211_v7  ;;  %5482 = vmatpush3.msra.mxu0 %v6204_v5 }
  0x35   :  { %5490 = vmatprep.subr.mxu1 %v6130_v0  ;;  %5483 = vmatprep.subr.mxu0 %v6130_v0 }
  0x36   :  { %5484 = vmatpush3.msra.mxu0 %v6208_v6 }
  0x37   :  { %5485 = vmatprep.subr.mxu0 %v6130_v0 }
  0x38   :  { %5486 = vmatpush3.msra.mxu0 %v6225_v10 }
  0x39   :  { %5506 = vmatprep.subr.mxu0 %v6130_v0 }
  0xd8   :  { %v157_v24 = vpop.f32.mrf.mxu0 }
  0xda   :  { %v5409_v25 = vpop.f32.mrf.mxu0  ;;  %v312_v26 = vpop.f32.mrf.mxu1 }
  0xdc   :  { %v235_v28 = vpop.f32.mrf.mxu0  ;;  %v5425_v30 = vpop.f32.mrf.mxu1 }
  0xdd   :  { %v236_v29 = vadd.f32 %v235_v28, %v157_v24 }
  0xde   :  { %v5414_v31 = vpop.f32.mrf.mxu0 }
  0xdf   :  { %v245_v32 = vadd.f32 %v6347_v27, %v236_v29  ;;  %v6434_v31 = vld [vmem:[%s7034_s0 + $0x4] sm:$0x3] }
  0xe0   :  { %v385_v34 = vpop.f32.mrf.mxu0 }
  0xe1   :  { %v5051_v35 = vmul.f32 -1.442695, %v245_v32  ;;  %v386_v36 = vadd.f32 %v385_v34, %v312_v26 }
  0xe2   :  { %v5430_v37 = vpop.f32.mrf.mxu0 }
  0xe3   :  { %5931 = vpow2.f32 %v5051_v35  ;;  %v395_v38 = vadd.f32 %v6353_v33, %v386_v36 }
  0xe4   :  { %v535_v39 = vpop.f32.mrf.mxu0 }
  0xe5   :  { %v5052_v40 = vmul.f32 -1.442695, %v395_v38  ;;  %v462_v41 = vpop.f32.mrf.mxu1 }
  0xe6   :  { %v5446_v42 = vpop.f32.mrf.mxu0  ;;  %v536_v49 = vadd.f32 %v535_v39, %v462_v41 }
  0xe7   :  { %5933 = vpow2.f32 %v5052_v40  ;;  %v5441_v43 = vpop.f32.mrf.mxu1 }
  0xe8   :  { %v545_v56 = vadd.f32 %v6364_v51, %v536_v49 }
  0xea   :  { %v685_v44 = vpop.f32.mrf.mxu1 }
  0xec   :  { %v612_v45 = vpop.f32.mrf.mxu0  ;;  %v5462_v47 = vpop.f32.mrf.mxu1 }
  0xed   :  { %v686_v48 = vadd.f32 %v685_v44, %v612_v45 }
  0xee   :  { %v5457_v50 = vpop.f32.mrf.mxu0 }
  0xef   :  { %v695_v52 = vadd.f32 %v6359_v46, %v686_v48 }
  0xf0   :  { %v5932_v53 = vpop.eup %5931 }
  0xf1   :  { %v699_v54 = vadd.f32 1.0, %v5932_v53  ;;  %v5053_v55 = vmul.f32 -1.442695, %v695_v52 }
  0xf3   :  { %5935 = vpow2.f32 %v5053_v55 }
  0xf4   :  { %v5934_v57 = vpop.eup %5933  ;;  %5937 = vrcp.f32 %v699_v54 }
  0xf5   :  { %v705_v58 = vadd.f32 1.0, %v5934_v57  ;;  %5939 = vtanh.f32 %v545_v56 }
  0xf7   :  { %5941 = vrcp.f32 %v705_v58 }
 0x100   :  { %v5936_v59 = vpop.eup %5935 }
 0x101   :  { %v5938_v60 = vpop.eup %5937  ;;  %v712_v63 = vadd.f32 1.0, %v5936_v59 }
 0x102   :  { %v5940_v62 = vpop.eup %5939 }
 0x103   :  { %v716_v24 = vmul.f32 %v5940_v62, %v5938_v60  ;;  %5943 = vrcp.f32 %v712_v63 }
 0x104   :  { %v5942_v8 = vpop.eup %5941 }
 0x105   :  { %v715_v11 = vmul.f32 %v5942_v8, %v85_v61 }
 0x107   :  { %v6368_v25 = vadd.f32 %v716_v24, %v715_v11 }
 0x109   :  { %5945 = vtanh.f32 %v6368_v25 }
 0x110   :  { %v5944_v26 = vpop.eup %5943 }
 0x116   :  { %v5946_v28 = vpop.eup %5945 }
 0x117   :  { %v719_v29 = vmul.f32 %v5946_v28, %v5944_v26 }
 0x119   :  { %5472 = vmatmul.mubr.msk.f32.vlgmr.msra.gmra.mxu1 %vm87_vm2, %v719_v29  ;;  %5488 = vmatmul.mubr.msk.f32.vlgmr.msra.gmra.mxu0 %vm87_vm2, %v719_v29 }
 0x11a   :  { %5491 = vmatpush3.msk.msra.mxu1 %vm165_vm3, %v6242_v13  ;;  %5507 = vmatpush3.msk.msra.mxu0 %vm165_vm3, %v6260_v15 }
 0x11b   :  { %5492 = vmatprep.mubr.msk.f32.mxu1 %vm6131_vm1, %v6130_v0  ;;  %5495 = vmatprep.subr.mxu1 %v6130_v0 }
 0x11c   :  { %5508 = vmatprep.mubr.msk.f32.mxu0 %vm6131_vm1, %v6130_v0  ;;  %5511 = vmatprep.subr.mxu0 %v6130_v0 }
 0x11d   :  { %5493 = vmatmul.mubr.msk.f32.vlgmr.msra.gmra.mxu1 %vm161_vm4, %v6330_v23  ;;  %5509 = vmatmul.mubr.msk.f32.vlgmr.msra.gmra.mxu0 %vm161_vm4, %v6330_v23 }
 0x11e   :  { %5496 = vmatpush3.msra.mxu1 %v6236_v12  ;;  %5512 = vmatpush3.msra.mxu0 %v6277_v18 }
 0x11f   :  { %5497 = vmatprep.subr.mxu1 %v6130_v0  ;;  %5513 = vmatprep.subr.mxu0 %v6130_v0 }
 0x120   :  { %5498 = vmatpush3.msra.mxu1 %v6249_v14  ;;  %5514 = vmatpush3.msra.mxu0 %v6282_v19 }
 0x121   :  { %5499 = vmatprep.subr.mxu1 %v6130_v0  ;;  %5515 = vmatprep.subr.mxu0 %v6130_v0 }
 0x122   :  { %5500 = vmatpush3.msra.mxu1 %v6262_v16  ;;  %5516 = vmatpush3.msra.mxu0 %v6292_v21 }
 0x123   :  { %5501 = vmatprep.subr.mxu1 %v6130_v0  ;;  %5517 = vmatprep.subr.mxu0 %v6130_v0 }
 0x124   :  { %5502 = vmatpush3.msra.mxu1 %v6272_v17  ;;  %5503 = vmatprep.mubr.msk.f32.mxu1 %vm6131_vm1, %v6130_v0 }
 0x125   :  { %5518 = vmatpush3.msra.mxu0 %v6299_v22  ;;  %5519 = vmatprep.mubr.msk.f32.mxu0 %vm6131_vm1, %v6130_v0 }
 0x126   :  { %5504 = vmatmul.mubr.msk.f32.vlgmr.msra.gmra.mxu1 %vm87_vm2, %v719_v29  ;;  %5520 = vmatmul.mubr.msk.f32.vlgmr.msra.gmra.mxu0 %vm87_vm2, %v719_v29 }
 0x127   :  { %5522 = vmatprep.subr.mxu1 %v6130_v0  ;;  %5524 = vmatprep.mubr.msk.f32.mxu1 %vm6131_vm1, %v6130_v0 }
 0x128   :  { %5523 = vmatpush3.msk.msra.mxu1 %vm165_vm3, %v6287_v20  ;;  %5538 = vmatprep.subr.mxu0 %v6130_v0 }
 0x129   :  { %5539 = vmatpush3.msk.msra.mxu0 %vm165_vm3, %v6220_v9  ;;  %5527 = vmatprep.subr.mxu1 %v6130_v0 }
 0x12a   :  { %5525 = vmatmul.mubr.msk.f32.vlgmr.msra.gmra.mxu1 %vm161_vm4, %v6330_v23  ;;  %5540 = vmatprep.mubr.msk.f32.mxu0 %vm6131_vm1, %v6130_v0  ;;  %v864_v23 = vpop.f32.mrf.mxu0 }
 0x12b   :  { %5543 = vmatprep.subr.mxu0 %v6130_v0  ;;  %5528 = vmatpush3.msra.mxu1 %v6193_v1 }
 0x12c   :  { %5529 = vmatprep.subr.mxu1 %v6130_v0  ;;  %5535 = vmatprep.mubr.msk.f32.mxu1 %vm6131_vm1, %v6130_v0  ;;  %v5478_v30 = vpop.f32.mrf.mxu0 }
 0x12d   :  { %5530 = vmatpush3.msra.mxu1 %v6195_v2  ;;  %5541 = vmatmul.mubr.msk.f32.vlgmr.msra.gmra.mxu0 %vm161_vm4, %v6434_v31 }
 0x12e   :  { %5531 = vmatprep.subr.mxu1 %v6130_v0  ;;  %5544 = vmatpush3.msra.mxu0 %v6198_v3 }
 0x12f   :  { %5532 = vmatpush3.msra.mxu1 %v6201_v4  ;;  %5551 = vmatprep.mubr.msk.f32.mxu0 %vm6131_vm1, %v6130_v0 }
 0x130   :  { %5533 = vmatprep.subr.mxu1 %v6130_v0  ;;  %5545 = vmatprep.subr.mxu0 %v6130_v0 }
 0x131   :  { %5534 = vmatpush3.msra.mxu1 %v6211_v7  ;;  %5546 = vmatpush3.msra.mxu0 %v6204_v5 }
 0x132   :  { %5554 = vmatprep.subr.mxu1 %v6130_v0  ;;  %5547 = vmatprep.subr.mxu0 %v6130_v0 }
 0x133   :  { %5548 = vmatpush3.msra.mxu0 %v6208_v6 }
 0x134   :  { %5549 = vmatprep.subr.mxu0 %v6130_v0 }
 0x135   :  { %5550 = vmatpush3.msra.mxu0 %v6225_v10 }
 0x136   :  { %5570 = vmatprep.subr.mxu0 %v6130_v0 }
 0x1d9   :  { %v791_v32 = vpop.f32.mrf.mxu1  ;;  %v935_v34 = vpop.f32.mrf.mxu0 }
 0x1da   :  { %v865_v35 = vadd.f32 %v864_v23, %v791_v32 }
 0x1db   :  { %v5473_v36 = vpop.f32.mrf.mxu1  ;;  %v5489_v37 = vpop.f32.mrf.mxu0 }
 0x1dc   :  { %v868_v38 = vadd.f32 %v6347_v27, %v865_v35  ;;  %v6519_v36 = vld [vmem:[%s7034_s0 + $0x6] sm:$0x3] }
 0x1dd   :  { %v1005_v39 = vpop.f32.mrf.mxu1  ;;  %v1146_v40 = vpop.f32.mrf.mxu0 }
 0x1de   :  { %v5067_v41 = vmul.f32 -1.442695, %v868_v38  ;;  %v1006_v42 = vadd.f32 %v1005_v39, %v935_v34 }
 0x1df   :  { %v5494_v43 = vpop.f32.mrf.mxu1  ;;  %v5510_v44 = vpop.f32.mrf.mxu0 }
 0x1e0   :  { %5947 = vpow2.f32 %v5067_v41  ;;  %v1009_v45 = vadd.f32 %v6353_v33, %v1006_v42 }
 0x1e2   :  { %v5068_v47 = vmul.f32 -1.442695, %v1009_v45 }
 0x1e4   :  { %5949 = vpow2.f32 %v5068_v47 }
 0x1e6   :  { %v1076_v48 = vpop.f32.mrf.mxu1  ;;  %v1217_v49 = vpop.f32.mrf.mxu0 }
 0x1e7   :  { %v1147_v54 = vadd.f32 %v1146_v40, %v1076_v48 }
 0x1e8   :  { %v5505_v50 = vpop.f32.mrf.mxu1  ;;  %v5521_v52 = vpop.f32.mrf.mxu0 }
 0x1e9   :  { %v1150_v60 = vadd.f32 %v6364_v51, %v1147_v54 }
 0x1ea   :  { %v1287_v53 = vpop.f32.mrf.mxu1 }
 0x1eb   :  { %v1288_v55 = vadd.f32 %v1287_v53, %v1217_v49 }
 0x1ec   :  { %v5526_v56 = vpop.f32.mrf.mxu1 }
 0x1ed   :  { %v5948_v57 = vpop.eup %5947  ;;  %v1291_v58 = vadd.f32 %v6359_v46, %v1288_v55 }
 0x1ee   :  { %v1295_v59 = vadd.f32 1.0, %v5948_v57 }
 0x1ef   :  { %v5069_v61 = vmul.f32 -1.442695, %v1291_v58 }
 0x1f1   :  { %v5950_v62 = vpop.eup %5949  ;;  %5951 = vpow2.f32 %v5069_v61 }
 0x1f2   :  { %5953 = vrcp.f32 %v1295_v59  ;;  %v1301_v63 = vadd.f32 1.0, %v5950_v62 }
 0x1f3   :  { %5955 = vtanh.f32 %v1150_v60 }
 0x1f4   :  { %5957 = vrcp.f32 %v1301_v63 }
 0x1fe   :  { %v5952_v8 = vpop.eup %5951 }
 0x1ff   :  { %v5954_v11 = vpop.eup %5953  ;;  %v1308_v28 = vadd.f32 1.0, %v5952_v8 }
 0x200   :  { %v5956_v24 = vpop.eup %5955 }
 0x201   :  { %v5958_v26 = vpop.eup %5957  ;;  %v1312_v23 = vmul.f32 %v5956_v24, %v5954_v11  ;;  %5959 = vrcp.f32 %v1308_v28 }
 0x202   :  { %v1311_v29 = vmul.f32 %v5958_v26, %v6368_v25  ;;  %v1460_v25 = vpop.f32.mrf.mxu0 }
 0x204   :  { %v6453_v30 = vadd.f32 %v1312_v23, %v1311_v29 }
 0x206   :  { %5961 = vtanh.f32 %v6453_v30 }
 0x20e   :  { %v5960_v32 = vpop.eup %5959 }
 0x213   :  { %v5962_v34 = vpop.eup %5961 }
 0x214   :  { %v1315_v35 = vmul.f32 %v5962_v34, %v5960_v32 }
 0x216   :  { %5536 = vmatmul.mubr.msk.f32.vlgmr.msra.gmra.mxu1 %vm87_vm2, %v1315_v35  ;;  %5552 = vmatmul.mubr.msk.f32.vlgmr.msra.gmra.mxu0 %vm87_vm2, %v1315_v35 }
 0x217   :  { %5555 = vmatpush3.msk.msra.mxu1 %vm165_vm3, %v6242_v13  ;;  %5571 = vmatpush3.msk.msra.mxu0 %vm165_vm3, %v6260_v15 }
 0x218   :  { %5556 = vmatprep.mubr.msk.f32.mxu1 %vm6131_vm1, %v6130_v0  ;;  %5559 = vmatprep.subr.mxu1 %v6130_v0 }
 0x219   :  { %5572 = vmatprep.mubr.msk.f32.mxu0 %vm6131_vm1, %v6130_v0  ;;  %5575 = vmatprep.subr.mxu0 %v6130_v0 }
 0x21a   :  { %5557 = vmatmul.mubr.msk.f32.vlgmr.msra.gmra.mxu1 %vm161_vm4, %v6434_v31  ;;  %5573 = vmatmul.mubr.msk.f32.vlgmr.msra.gmra.mxu0 %vm161_vm4, %v6434_v31 }
 0x21b   :  { %5560 = vmatpush3.msra.mxu1 %v6236_v12  ;;  %5576 = vmatpush3.msra.mxu0 %v6277_v18 }
 0x21c   :  { %5561 = vmatprep.subr.mxu1 %v6130_v0  ;;  %5577 = vmatprep.subr.mxu0 %v6130_v0 }
 0x21d   :  { %5562 = vmatpush3.msra.mxu1 %v6249_v14  ;;  %5578 = vmatpush3.msra.mxu0 %v6282_v19 }
 0x21e   :  { %5563 = vmatprep.subr.mxu1 %v6130_v0  ;;  %5579 = vmatprep.subr.mxu0 %v6130_v0 }
 0x21f   :  { %5564 = vmatpush3.msra.mxu1 %v6262_v16  ;;  %5580 = vmatpush3.msra.mxu0 %v6292_v21 }
 0x220   :  { %5565 = vmatprep.subr.mxu1 %v6130_v0  ;;  %5581 = vmatprep.subr.mxu0 %v6130_v0 }
 0x221   :  { %5566 = vmatpush3.msra.mxu1 %v6272_v17  ;;  %5567 = vmatprep.mubr.msk.f32.mxu1 %vm6131_vm1, %v6130_v0 }
 0x222   :  { %5582 = vmatpush3.msra.mxu0 %v6299_v22  ;;  %5583 = vmatprep.mubr.msk.f32.mxu0 %vm6131_vm1, %v6130_v0 }
 0x223   :  { %5568 = vmatmul.mubr.msk.f32.vlgmr.msra.gmra.mxu1 %vm87_vm2, %v1315_v35  ;;  %5584 = vmatmul.mubr.msk.f32.vlgmr.msra.gmra.mxu0 %vm87_vm2, %v1315_v35 }
 0x224   :  { %5586 = vmatprep.subr.mxu1 %v6130_v0  ;;  %5588 = vmatprep.mubr.msk.f32.mxu1 %vm6131_vm1, %v6130_v0 }
 0x225   :  { %5587 = vmatpush3.msk.msra.mxu1 %vm165_vm3, %v6287_v20  ;;  %5602 = vmatprep.subr.mxu0 %v6130_v0 }
 0x226   :  { %5603 = vmatpush3.msk.msra.mxu0 %vm165_vm3, %v6220_v9  ;;  %5591 = vmatprep.subr.mxu1 %v6130_v0 }
 0x227   :  { %5589 = vmatmul.mubr.msk.f32.vlgmr.msra.gmra.mxu1 %vm161_vm4, %v6434_v31  ;;  %5604 = vmatprep.mubr.msk.f32.mxu0 %vm6131_vm1, %v6130_v0  ;;  %v5542_v31 = vpop.f32.mrf.mxu0 }
 0x228   :  { %5607 = vmatprep.subr.mxu0 %v6130_v0  ;;  %5592 = vmatpush3.msra.mxu1 %v6193_v1 }
 0x229   :  { %5593 = vmatprep.subr.mxu1 %v6130_v0  ;;  %5599 = vmatprep.mubr.msk.f32.mxu1 %vm6131_vm1, %v6130_v0 }
 0x22a   :  { %5594 = vmatpush3.msra.mxu1 %v6195_v2  ;;  %5605 = vmatmul.mubr.msk.f32.vlgmr.msra.gmra.mxu0 %vm161_vm4, %v6519_v36 }
 0x22b   :  { %5595 = vmatprep.subr.mxu1 %v6130_v0  ;;  %5608 = vmatpush3.msra.mxu0 %v6198_v3 }
 0x22c   :  { %5596 = vmatpush3.msra.mxu1 %v6201_v4  ;;  %5615 = vmatprep.mubr.msk.f32.mxu0 %vm6131_vm1, %v6130_v0 }
 0x22d   :  { %5597 = vmatprep.subr.mxu1 %v6130_v0  ;;  %5609 = vmatprep.subr.mxu0 %v6130_v0 }
 0x22e   :  { %5598 = vmatpush3.msra.mxu1 %v6211_v7  ;;  %5610 = vmatpush3.msra.mxu0 %v6204_v5 }
 0x22f   :  { %5618 = vmatprep.subr.mxu1 %v6130_v0  ;;  %5611 = vmatprep.subr.mxu0 %v6130_v0 }
 0x230   :  { %5612 = vmatpush3.msra.mxu0 %v6208_v6 }
 0x231   :  { %5613 = vmatprep.subr.mxu0 %v6130_v0 }
 0x232   :  { %5614 = vmatpush3.msra.mxu0 %v6225_v10 }
 0x233   :  { %5634 = vmatprep.subr.mxu0 %v6130_v0 }
 0x2d6   :  { %v1387_v37 = vpop.f32.mrf.mxu1  ;;  %v1531_v38 = vpop.f32.mrf.mxu0 }
 0x2d7   :  { %v1461_v39 = vadd.f32 %v1460_v25, %v1387_v37 }
 0x2d8   :  { %v5537_v40 = vpop.f32.mrf.mxu1  ;;  %v5553_v41 = vpop.f32.mrf.mxu0 }
 0x2d9   :  { %v1464_v42 = vadd.f32 %v6347_v27, %v1461_v39 }
 0x2da   :  { %v1601_v43 = vpop.f32.mrf.mxu1  ;;  %v1742_v44 = vpop.f32.mrf.mxu0 }
 0x2db   :  { %v5083_v45 = vmul.f32 -1.442695, %v1464_v42  ;;  %v1602_v47 = vadd.f32 %v1601_v43, %v1531_v38 }
 0x2dc   :  { %v5558_v48 = vpop.f32.mrf.mxu1  ;;  %v5574_v49 = vpop.f32.mrf.mxu0 }
 0x2dd   :  { %5963 = vpow2.f32 %v5083_v45  ;;  %v1605_v50 = vadd.f32 %v6353_v33, %v1602_v47 }
 0x2df   :  { %v5084_v52 = vmul.f32 -1.442695, %v1605_v50 }
 0x2e1   :  { %5965 = vpow2.f32 %v5084_v52 }
 0x2e3   :  { %v1672_v53 = vpop.f32.mrf.mxu1  ;;  %v1813_v54 = vpop.f32.mrf.mxu0 }
 0x2e4   :  { %v1743_v58 = vadd.f32 %v1742_v44, %v1672_v53 }
 0x2e5   :  { %v5569_v55 = vpop.f32.mrf.mxu1  ;;  %v5585_v56 = vpop.f32.mrf.mxu0 }
 0x2e6   :  { %v1746_v8 = vadd.f32 %v6364_v51, %v1743_v58 }
 0x2e7   :  { %v1883_v57 = vpop.f32.mrf.mxu1 }
 0x2e8   :  { %v1884_v59 = vadd.f32 %v1883_v57, %v1813_v54 }
 0x2e9   :  { %v5590_v60 = vpop.f32.mrf.mxu1 }
 0x2ea   :  { %v5964_v61 = vpop.eup %5963  ;;  %v1887_v62 = vadd.f32 %v6359_v46, %v1884_v59 }
 0x2eb   :  { %v1891_v63 = vadd.f32 1.0, %v5964_v61 }
 0x2ec   :  { %v5085_v11 = vmul.f32 -1.442695, %v1887_v62 }
 0x2ee   :  { %v5966_v24 = vpop.eup %5965  ;;  %5967 = vpow2.f32 %v5085_v11 }
 0x2ef   :  { %5969 = vrcp.f32 %v1891_v63  ;;  %v1897_v26 = vadd.f32 1.0, %v5966_v24 }
 0x2f0   :  { %5971 = vtanh.f32 %v1746_v8 }
 0x2f1   :  { %5973 = vrcp.f32 %v1897_v26 }
 0x2fb   :  { %v5968_v28 = vpop.eup %5967 }
 0x2fc   :  { %v5970_v29 = vpop.eup %5969  ;;  %v1904_v34 = vadd.f32 1.0, %v5968_v28 }
 0x2fd   :  { %v5972_v23 = vpop.eup %5971 }
 0x2fe   :  { %v5974_v32 = vpop.eup %5973  ;;  %v1908_v25 = vmul.f32 %v5972_v23, %v5970_v29  ;;  %5975 = vrcp.f32 %v1904_v34 }
 0x2ff   :  { %v1907_v35 = vmul.f32 %v5974_v32, %v6453_v30  ;;  %v2056_v30 = vpop.f32.mrf.mxu0 }
 0x301   :  { %v6538_v31 = vadd.f32 %v1908_v25, %v1907_v35 }
 0x303   :  { %5977 = vtanh.f32 %v6538_v31 }
 0x30b   :  { %v5976_v37 = vpop.eup %5975 }
 0x310   :  { %v5978_v38 = vpop.eup %5977 }
 0x311   :  { %v1911_v39 = vmul.f32 %v5978_v38, %v5976_v37 }
 0x313   :  { %5600 = vmatmul.mubr.msk.f32.vlgmr.msra.gmra.mxu1 %vm87_vm2, %v1911_v39  ;;  %5616 = vmatmul.mubr.msk.f32.vlgmr.msra.gmra.mxu0 %vm87_vm2, %v1911_v39 }
 0x314   :  { %5619 = vmatpush3.msk.msra.mxu1 %vm165_vm3, %v6242_v13  ;;  %5635 = vmatpush3.msk.msra.mxu0 %vm165_vm3, %v6260_v15 }
 0x315   :  { %5620 = vmatprep.mubr.msk.f32.mxu1 %vm6131_vm1, %v6130_v0  ;;  %5623 = vmatprep.subr.mxu1 %v6130_v0 }
 0x316   :  { %5636 = vmatprep.mubr.msk.f32.mxu0 %vm6131_vm1, %v6130_v0  ;;  %5639 = vmatprep.subr.mxu0 %v6130_v0 }
 0x317   :  { %5621 = vmatmul.mubr.msk.f32.vlgmr.msra.gmra.mxu1 %vm161_vm4, %v6519_v36  ;;  %5637 = vmatmul.mubr.msk.f32.vlgmr.msra.gmra.mxu0 %vm161_vm4, %v6519_v36 }
 0x318   :  { %5624 = vmatpush3.msra.mxu1 %v6236_v12  ;;  %5640 = vmatpush3.msra.mxu0 %v6277_v18 }
 0x319   :  { %5625 = vmatprep.subr.mxu1 %v6130_v0  ;;  %5641 = vmatprep.subr.mxu0 %v6130_v0 }
 0x31a   :  { %5626 = vmatpush3.msra.mxu1 %v6249_v14  ;;  %5642 = vmatpush3.msra.mxu0 %v6282_v19 }
 0x31b   :  { %5627 = vmatprep.subr.mxu1 %v6130_v0  ;;  %5643 = vmatprep.subr.mxu0 %v6130_v0 }
 0x31c   :  { %5628 = vmatpush3.msra.mxu1 %v6262_v16  ;;  %5644 = vmatpush3.msra.mxu0 %v6292_v21 }
 0x31d   :  { %5629 = vmatprep.subr.mxu1 %v6130_v0  ;;  %5645 = vmatprep.subr.mxu0 %v6130_v0 }
 0x31e   :  { %5630 = vmatpush3.msra.mxu1 %v6272_v17  ;;  %5631 = vmatprep.mubr.msk.f32.mxu1 %vm6131_vm1, %v6130_v0 }
 0x31f   :  { %5646 = vmatpush3.msra.mxu0 %v6299_v22  ;;  %5647 = vmatprep.mubr.msk.f32.mxu0 %vm6131_vm1, %v6130_v0 }
 0x320   :  { %5632 = vmatmul.mubr.msk.f32.vlgmr.msra.gmra.mxu1 %vm87_vm2, %v1911_v39  ;;  %5648 = vmatmul.mubr.msk.f32.vlgmr.msra.gmra.mxu0 %vm87_vm2, %v1911_v39 }
 0x321   :  { %5650 = vmatprep.subr.mxu1 %v6130_v0  ;;  %5652 = vmatprep.mubr.msk.f32.mxu1 %vm6131_vm1, %v6130_v0 }
 0x322   :  { %5651 = vmatpush3.msk.msra.mxu1 %vm165_vm3, %v6287_v20  ;;  %5666 = vmatprep.subr.mxu0 %v6130_v0 }
 0x323   :  { %5667 = vmatpush3.msk.msra.mxu0 %vm165_vm3, %v6220_v9  ;;  %5655 = vmatprep.subr.mxu1 %v6130_v0 }
 0x324   :  { %5653 = vmatmul.mubr.msk.f32.vlgmr.msra.gmra.mxu1 %vm161_vm4, %v6519_v36  ;;  %5668 = vmatprep.mubr.msk.f32.mxu0 %vm6131_vm1, %v6130_v0  ;;  %v5606_v36 = vpop.f32.mrf.mxu0 }
 0x325   :  { %5671 = vmatprep.subr.mxu0 %v6130_v0  ;;  %5656 = vmatpush3.msra.mxu1 %v6193_v1  ;;  %v6604_v1 = vld [vmem:[%s7034_s0 + $0x8] sm:$0x3] }
 0x326   :  { %5657 = vmatprep.subr.mxu1 %v6130_v0  ;;  %5663 = vmatprep.mubr.msk.f32.mxu1 %vm6131_vm1, %v6130_v0 }
 0x327   :  { %5658 = vmatpush3.msra.mxu1 %v6195_v2  ;;  %5669 = vmatmul.mubr.msk.f32.vlgmr.msra.gmra.mxu0 %vm161_vm4, %v6604_v1 }
 0x328   :  { %5659 = vmatprep.subr.mxu1 %v6130_v0  ;;  %5672 = vmatpush3.msra.mxu0 %v6198_v3 }
 0x329   :  { %5660 = vmatpush3.msra.mxu1 %v6201_v4  ;;  %5679 = vmatprep.mubr.msk.f32.mxu0 %vm6131_vm1, %v6130_v0 }
 0x32a   :  { %5661 = vmatprep.subr.mxu1 %v6130_v0  ;;  %5673 = vmatprep.subr.mxu0 %v6130_v0 }
 0x32b   :  { %5662 = vmatpush3.msra.mxu1 %v6211_v7  ;;  %5674 = vmatpush3.msra.mxu0 %v6204_v5 }
 0x32c   :  { %5682 = vmatprep.subr.mxu1 %v6130_v0  ;;  %5675 = vmatprep.subr.mxu0 %v6130_v0 }
 0x32d   :  { %5676 = vmatpush3.msra.mxu0 %v6208_v6 }
 0x32e   :  { %5677 = vmatprep.subr.mxu0 %v6130_v0 }
 0x32f   :  { %5678 = vmatpush3.msra.mxu0 %v6225_v10 }
 0x330   :  { %5698 = vmatprep.subr.mxu0 %v6130_v0 }
 0x3d3   :  { %v1983_v2 = vpop.f32.mrf.mxu1  ;;  %v2127_v4 = vpop.f32.mrf.mxu0 }
 0x3d4   :  { %v2057_v3 = vadd.f32 %v2056_v30, %v1983_v2 }
 0x3d5   :  { %v5601_v40 = vpop.f32.mrf.mxu1  ;;  %v5617_v41 = vpop.f32.mrf.mxu0 }
 0x3d6   :  { %v2060_v42 = vadd.f32 %v6347_v27, %v2057_v3 }
 0x3d7   :  { %v2197_v43 = vpop.f32.mrf.mxu1  ;;  %v2338_v44 = vpop.f32.mrf.mxu0 }
 0x3d8   :  { %v5099_v5 = vmul.f32 -1.442695, %v2060_v42  ;;  %v2198_v45 = vadd.f32 %v2197_v43, %v2127_v4 }
 0x3d9   :  { %v5622_v47 = vpop.f32.mrf.mxu1  ;;  %v5638_v48 = vpop.f32.mrf.mxu0 }
 0x3da   :  { %5979 = vpow2.f32 %v5099_v5  ;;  %v2201_v6 = vadd.f32 %v6353_v33, %v2198_v45 }
 0x3dc   :  { %v5100_v49 = vmul.f32 -1.442695, %v2201_v6 }
 0x3de   :  { %5981 = vpow2.f32 %v5100_v49 }
 0x3e0   :  { %v2268_v50 = vpop.f32.mrf.mxu1  ;;  %v2409_v52 = vpop.f32.mrf.mxu0 }
 0x3e1   :  { %v2339_v56 = vadd.f32 %v2338_v44, %v2268_v50 }
 0x3e2   :  { %v5633_v53 = vpop.f32.mrf.mxu1  ;;  %v5649_v54 = vpop.f32.mrf.mxu0 }
 0x3e3   :  { %v2342_v62 = vadd.f32 %v6364_v51, %v2339_v56 }
 0x3e4   :  { %v2479_v55 = vpop.f32.mrf.mxu1 }
 0x3e5   :  { %v2480_v57 = vadd.f32 %v2479_v55, %v2409_v52 }
 0x3e6   :  { %v5654_v58 = vpop.f32.mrf.mxu1 }
 0x3e7   :  { %v5980_v59 = vpop.eup %5979  ;;  %v2483_v60 = vadd.f32 %v6359_v46, %v2480_v57 }
 0x3e8   :  { %v2487_v61 = vadd.f32 1.0, %v5980_v59 }
 0x3e9   :  { %v5101_v63 = vmul.f32 -1.442695, %v2483_v60 }
 0x3eb   :  { %v5982_v8 = vpop.eup %5981  ;;  %5983 = vpow2.f32 %v5101_v63  ;;  %v6728_v63 = vld [vmem:[%s7035_s1 + $0x4] sm:$0xf] }
 0x3ec   :  { %5985 = vrcp.f32 %v2487_v61  ;;  %v2493_v11 = vadd.f32 1.0, %v5982_v8  ;;  %v6735_v8 = vld [vmem:[%s7035_s1 + $0x8] sm:$0xf] }
 0x3ed   :  { %5987 = vtanh.f32 %v2342_v62 }
 0x3ee   :  { %5989 = vrcp.f32 %v2493_v11  ;;  %v6749_v11 = vld [vmem:[#allocation4 + $0x58] sm:$0xff] }
 0x3f8   :  { %v5984_v24 = vpop.eup %5983 }
 0x3f9   :  { %v5986_v26 = vpop.eup %5985  ;;  %v2500_v23 = vadd.f32 1.0, %v5984_v24  ;;  %v6752_v24 = vld [vmem:[#allocation4 + $0x78] sm:$0xff] }
 0x3fa   :  { %v5988_v28 = vpop.eup %5987 }
 0x3fb   :  { %v5990_v29 = vpop.eup %5989  ;;  %v2504_v34 = vmul.f32 %v5988_v28, %v5986_v26  ;;  %5991 = vrcp.f32 %v2500_v23  ;;  %v6757_v26 = vld [vmem:[#allocation4 + $0x50] sm:$0xff]  ;;  %v6768_v23 = vld [vmem:[#allocation4 + $0x68] sm:$0xff] }
 0x3fc   :  { %v2503_v32 = vmul.f32 %v5990_v29, %v6538_v31  ;;  %v6760_v28 = vld [vmem:[#allocation4 + $0x70] sm:$0xff]  ;;  %v6765_v29 = vld [vmem:[#allocation4 + $0x48] sm:$0xff] }
 0x3fe   :  { %v6623_v35 = vadd.f32 %v2504_v34, %v2503_v32  ;;  %v6773_v32 = vld [vmem:[#allocation4 + $0x40] sm:$0xff] }
 0x3ff   :  { %v6778_v34 = vld [vmem:[#allocation4 + $0x60] sm:$0xff] }
 0x400   :  { %5993 = vtanh.f32 %v6623_v35 }
 0x408   :  { %v5992_v25 = vpop.eup %5991 }
 0x40d   :  { %v5994_v37 = vpop.eup %5993 }
 0x40e   :  { %v2507_v38 = vmul.f32 %v5994_v37, %v5992_v25  ;;  %v6799_v25 = vld [vmem:[%s7035_s1] sm:$0xf]  ;;  %v6817_v37 = vld [vmem:[#allocation4] sm:$0xff] }
 0x410   :  { %5664 = vmatmul.mubr.msk.f32.vlgmr.msra.gmra.mxu1 %vm87_vm2, %v2507_v38  ;;  %5680 = vmatmul.mubr.msk.f32.vlgmr.msra.gmra.mxu0 %vm87_vm2, %v2507_v38 }
 0x411   :  { %5683 = vmatpush3.msk.msra.mxu1 %vm165_vm3, %v6242_v13  ;;  %5699 = vmatpush3.msk.msra.mxu0 %vm165_vm3, %v6260_v15  ;;  %v6686_v13 = vld [vmem:[#allocation4 + $0x8] sm:$0xff] }
 0x412   :  { %5684 = vmatprep.mubr.msk.f32.mxu1 %vm6131_vm1, %v6130_v0  ;;  %5687 = vmatprep.subr.mxu1 %v6130_v0 }
 0x413   :  { %5700 = vmatprep.mubr.msk.f32.mxu0 %vm6131_vm1, %v6130_v0  ;;  %5703 = vmatprep.subr.mxu0 %v6130_v0 }
 0x414   :  { %5685 = vmatmul.mubr.msk.f32.vlgmr.msra.gmra.mxu1 %vm161_vm4, %v6604_v1  ;;  %5701 = vmatmul.mubr.msk.f32.vlgmr.msra.gmra.mxu0 %vm161_vm4, %v6604_v1 }
 0x415   :  { %5688 = vmatpush3.msra.mxu1 %v6236_v12  ;;  %5704 = vmatpush3.msra.mxu0 %v6277_v18  ;;  %v6676_v12 = vld [vmem:[#allocation4 + $0x18] sm:$0xff]  ;;  %v6709_v18 = vld [vmem:[#allocation4 + $0x28] sm:$0xff] }
 0x416   :  { %5689 = vmatprep.subr.mxu1 %v6130_v0  ;;  %5705 = vmatprep.subr.mxu0 %v6130_v0 }
 0x417   :  { %5690 = vmatpush3.msra.mxu1 %v6249_v14  ;;  %5706 = vmatpush3.msra.mxu0 %v6282_v19  ;;  %v2652_v14 = vpop.f32.mrf.mxu0 }
 0x418   :  { %5691 = vmatprep.subr.mxu1 %v6130_v0  ;;  %5707 = vmatprep.subr.mxu0 %v6130_v0 }
 0x419   :  { %5692 = vmatpush3.msra.mxu1 %v6262_v16  ;;  %5708 = vmatpush3.msra.mxu0 %v6292_v21  ;;  %v5670_v15 = vpop.f32.mrf.mxu0  ;;  %v6695_v16 = vld [vmem:[%s7034_s0 + $0xa] sm:$0x3] }
 0x41a   :  { %5693 = vmatprep.subr.mxu1 %v6130_v0  ;;  %5709 = vmatprep.subr.mxu0 %v6130_v0  ;;  %v6824_v15 = vld [vmem:[%s7034_s0 + $0xc] sm:$0x3] }
 0x41b   :  { %5694 = vmatpush3.msra.mxu1 %v6272_v17  ;;  %5695 = vmatprep.mubr.msk.f32.mxu1 %vm6131_vm1, %v6130_v0  ;;  %v6699_v17 = vld [vmem:[#allocation4 + $0x38] sm:$0xff] }
 0x41c   :  { %5710 = vmatpush3.msra.mxu0 %v6299_v22  ;;  %5711 = vmatprep.mubr.msk.f32.mxu0 %vm6131_vm1, %v6130_v0 }
 0x41d   :  { %5696 = vmatmul.mubr.msk.f32.vlgmr.msra.gmra.mxu1 %vm87_vm2, %v2507_v38  ;;  %5712 = vmatmul.mubr.msk.f32.vlgmr.msra.gmra.mxu0 %vm87_vm2, %v2507_v38 }
 0x41e   :  { %5714 = vmatprep.subr.mxu1 %v6130_v0  ;;  %5716 = vmatprep.mubr.msk.f32.mxu1 %vm6131_vm1, %v6130_v0 }
 0x41f   :  { %5715 = vmatpush3.msk.msra.mxu1 %vm165_vm3, %v6287_v20  ;;  %5730 = vmatprep.subr.mxu0 %v6130_v0 }
 0x420   :  { %5731 = vmatpush3.msk.msra.mxu0 %vm165_vm3, %v6220_v9  ;;  %5719 = vmatprep.subr.mxu1 %v6130_v0  ;;  %v6682_v9 = vld [vmem:[#allocation4 + $0x10] sm:$0xff] }
 0x421   :  { %5717 = vmatmul.mubr.msk.f32.vlgmr.msra.gmra.mxu1 %vm161_vm4, %v6604_v1  ;;  %5732 = vmatprep.mubr.msk.f32.mxu0 %vm6131_vm1, %v6130_v0 }
 0x422   :  { %5735 = vmatprep.subr.mxu0 %v6130_v0  ;;  %5720 = vmatpush3.msra.mxu1 %v6676_v12 }
 0x423   :  { %5721 = vmatprep.subr.mxu1 %v6130_v0  ;;  %5727 = vmatprep.mubr.msk.f32.mxu1 %vm6131_vm1, %v6130_v0 }
 0x424   :  { %5722 = vmatpush3.msra.mxu1 %v6682_v9  ;;  %5733 = vmatmul.mubr.msk.f32.vlgmr.msra.gmra.mxu0 %vm161_vm4, %v6695_v16 }
 0x425   :  { %5723 = vmatprep.subr.mxu1 %v6130_v0  ;;  %5736 = vmatpush3.msra.mxu0 %v6699_v17 }
 0x426   :  { %5724 = vmatpush3.msra.mxu1 %v6686_v13  ;;  %5743 = vmatprep.mubr.msk.f32.mxu0 %vm6131_vm1, %v6130_v0 }
 0x427   :  { %5725 = vmatprep.subr.mxu1 %v6130_v0  ;;  %5737 = vmatprep.subr.mxu0 %v6130_v0 }
 0x428   :  { %5726 = vmatpush3.msra.mxu1 %v6211_v7  ;;  %v6705_v7 = vld [vmem:[#allocation4 + $0x30] sm:$0xff] }
 0x429   :  { %5746 = vmatprep.subr.mxu1 %v6130_v0  ;;  %5738 = vmatpush3.msra.mxu0 %v6705_v7 }
 0x42a   :  { %5739 = vmatprep.subr.mxu0 %v6130_v0 }
 0x42b   :  { %5740 = vmatpush3.msra.mxu0 %v6709_v18 }
 0x42c   :  { %5741 = vmatprep.subr.mxu0 %v6130_v0 }
 0x42d   :  { %5742 = vmatpush3.msra.mxu0 %v6225_v10 }
 0x42e   :  { %5762 = vmatprep.subr.mxu0 %v6130_v0 }
 0x4d0   :  { %v2579_v19 = vpop.f32.mrf.mxu1  ;;  %v2723_v20 = vpop.f32.mrf.mxu0 }
 0x4d1   :  { %v2653_v21 = vadd.f32 %v2652_v14, %v2579_v19 }
 0x4d2   :  { %v5665_v22 = vpop.f32.mrf.mxu1  ;;  %v5681_v31 = vpop.f32.mrf.mxu0 }
 0x4d3   :  { %v2656_v39 = vadd.f32 %v6347_v27, %v2653_v21 }
 0x4d4   :  { %v2793_v30 = vpop.f32.mrf.mxu1  ;;  %v2934_v36 = vpop.f32.mrf.mxu0 }
 0x4d5   :  { %v5115_v1 = vmul.f32 -1.442695, %v2656_v39  ;;  %v2794_v2 = vadd.f32 %v2793_v30, %v2723_v20  ;;  %v6843_v39 = vld [vmem:[%s7037_s3] ss:$0 sm:$0xff] }
 0x4d6   :  { %v5686_v4 = vpop.f32.mrf.mxu1  ;;  %v5702_v3 = vpop.f32.mrf.mxu0 }
 0x4d7   :  { %5995 = vpow2.f32 %v5115_v1  ;;  %v2797_v40 = vadd.f32 %v6353_v33, %v2794_v2 }
 0x4d9   :  { %v5116_v41 = vmul.f32 -1.442695, %v2797_v40 }
 0x4db   :  { %5997 = vpow2.f32 %v5116_v41  ;;  %v6849_v41 = vld [vmem:[%s7037_s3 + $0x1] ss:$0 sm:$0xff] }
 0x4dd   :  { %v2864_v10 = vpop.f32.mrf.mxu1  ;;  %v3005_v42 = vpop.f32.mrf.mxu0 }
 0x4de   :  { %v2935_v45 = vadd.f32 %v2934_v36, %v2864_v10 }
 0x4df   :  { %v5697_v43 = vpop.f32.mrf.mxu1  ;;  %v5713_v44 = vpop.f32.mrf.mxu0 }
 0x4e0   :  { %v2938_v50 = vadd.f32 %v6364_v51, %v2935_v45 }
 0x4e1   :  { %v3075_v5 = vpop.f32.mrf.mxu1 }
 0x4e2   :  { %v3076_v47 = vadd.f32 %v3075_v5, %v3005_v42 }
 0x4e3   :  { %v5718_v48 = vpop.f32.mrf.mxu1 }
 0x4e4   :  { %v5996_v27 = vpop.eup %5995  ;;  %v3079_v6 = vadd.f32 %v6359_v46, %v3076_v47  ;;  %v3248_v38 = vpop.f32.mrf.mxu0 }
 0x4e5   :  { %v3083_v49 = vadd.f32 1.0, %v5996_v27 }
 0x4e6   :  { %v5117_v52 = vmul.f32 -1.442695, %v3079_v6  ;;  %v5734_v14 = vpop.f32.mrf.mxu0 }
 0x4e8   :  { %v5998_v53 = vpop.eup %5997  ;;  %5999 = vpow2.f32 %v5117_v52 }
 0x4e9   :  { %6001 = vrcp.f32 %v3083_v49  ;;  %v3089_v33 = vadd.f32 1.0, %v5998_v53 }
 0x4ea   :  { %6003 = vtanh.f32 %v2938_v50  ;;  %v6855_v50 = vld [vmem:[%s7037_s3 + $0x3] ss:$0 sm:$0xff] }
 0x4eb   :  { %6005 = vrcp.f32 %v3089_v33  ;;  %v6861_v33 = vld [vmem:[%s7037_s3 + $0x2] ss:$0 sm:$0xff] }
 0x4f5   :  { %v6000_v54 = vpop.eup %5999 }
 0x4f6   :  { %v6002_v55 = vpop.eup %6001  ;;  %v3096_v58 = vadd.f32 1.0, %v6000_v54 }
 0x4f7   :  { %v6004_v56 = vpop.eup %6003 }
 0x4f8   :  { %v6006_v57 = vpop.eup %6005  ;;  %v3100_v60 = vmul.f32 %v6004_v56, %v6002_v55  ;;  %6007 = vrcp.f32 %v3096_v58 }
 0x4f9   :  { %v3099_v59 = vmul.f32 %v6006_v57, %v6623_v35  ;;  %v6791_v35 = vld [vmem:[%s7035_s1 + $0xc] sm:$0xf]  ;;  %s5020_s1 = sshll.u32 %s6134_s23, 4  ;;  %s5021_s1 = int_to_ptr.vmem [resolvable:$true] %s5020_s1 }
 0x4fa   :  { %p6108_p6 = scmp.lt.s32.totalorder %s5021_s1, %s5021_s1 }
 0x4fb   :  { %v6720_v61 = vadd.f32 %v3100_v60, %v3099_v59 }
 0x4fd   :  { %6009 = vtanh.f32 %v6720_v61 }
 0x505   :  { %v6008_v46 = vpop.eup %6007 }
 0x50a   :  { %v6010_v51 = vpop.eup %6009 }
 0x50b   :  { %v3103_v62 = vmul.f32 %v6010_v51, %v6008_v46 }
 0x50d   :  { %5728 = vmatmul.mubr.msk.f32.vlgmr.msra.gmra.mxu1 %vm87_vm2, %v3103_v62  ;;  %5744 = vmatmul.mubr.msk.f32.vlgmr.msra.gmra.mxu0 %vm87_vm2, %v3103_v62 }
 0x50e   :  { %5747 = vmatpush3.msk.msra.mxu1 %vm165_vm3, %v6728_v63  ;;  %5763 = vmatpush3.msk.msra.mxu0 %vm165_vm3, %v6735_v8 }
 0x50f   :  { %5748 = vmatprep.mubr.msk.f32.mxu1 %vm6131_vm1, %v6130_v0  ;;  %5751 = vmatprep.subr.mxu1 %v6130_v0 }
 0x510   :  { %5764 = vmatprep.mubr.msk.f32.mxu0 %vm6131_vm1, %v6130_v0  ;;  %5767 = vmatprep.subr.mxu0 %v6130_v0 }
 0x511   :  { %5749 = vmatmul.mubr.msk.f32.vlgmr.msra.gmra.mxu1 %vm161_vm4, %v6695_v16  ;;  %5765 = vmatmul.mubr.msk.f32.vlgmr.msra.gmra.mxu0 %vm161_vm4, %v6695_v16 }
 0x512   :  { %5752 = vmatpush3.msra.mxu1 %v6749_v11  ;;  %5768 = vmatpush3.msra.mxu0 %v6752_v24 }
 0x513   :  { %5753 = vmatprep.subr.mxu1 %v6130_v0  ;;  %5769 = vmatprep.subr.mxu0 %v6130_v0 }
 0x514   :  { %5754 = vmatpush3.msra.mxu1 %v6757_v26  ;;  %5770 = vmatpush3.msra.mxu0 %v6760_v28 }
 0x515   :  { %5755 = vmatprep.subr.mxu1 %v6130_v0  ;;  %5771 = vmatprep.subr.mxu0 %v6130_v0 }
 0x516   :  { %5756 = vmatpush3.msra.mxu1 %v6765_v29  ;;  %5772 = vmatpush3.msra.mxu0 %v6768_v23 }
 0x517   :  { %5757 = vmatprep.subr.mxu1 %v6130_v0  ;;  %5773 = vmatprep.subr.mxu0 %v6130_v0 }
 0x518   :  { %5758 = vmatpush3.msra.mxu1 %v6773_v32  ;;  %5759 = vmatprep.mubr.msk.f32.mxu1 %vm6131_vm1, %v6130_v0 }
 0x519   :  { %5774 = vmatpush3.msra.mxu0 %v6778_v34  ;;  %5775 = vmatprep.mubr.msk.f32.mxu0 %vm6131_vm1, %v6130_v0 }
 0x51a   :  { %5760 = vmatmul.mubr.msk.f32.vlgmr.msra.gmra.mxu1 %vm87_vm2, %v3103_v62  ;;  %5776 = vmatmul.mubr.msk.f32.vlgmr.msra.gmra.mxu0 %vm87_vm2, %v3103_v62 }
 0x51b   :  { %5778 = vmatprep.subr.mxu1 %v6130_v0  ;;  %5780 = vmatprep.mubr.msk.f32.mxu1 %vm6131_vm1, %v6130_v0 }
 0x51c   :  { %5779 = vmatpush3.msk.msra.mxu1 %vm165_vm3, %v6791_v35  ;;  %5794 = vmatprep.subr.mxu0 %v6130_v0 }
 0x51d   :  { %5795 = vmatpush3.msk.msra.mxu0 %vm165_vm3, %v6799_v25  ;;  %5783 = vmatprep.subr.mxu1 %v6130_v0 }
 0x51e   :  { %5781 = vmatmul.mubr.msk.f32.vlgmr.msra.gmra.mxu1 %vm161_vm4, %v6695_v16  ;;  %5796 = vmatprep.mubr.msk.f32.mxu0 %vm6131_vm1, %v6130_v0  ;;  %v6836_v16 = vld [vmem:[#allocation4 + $0x20] sm:$0xff] }
 0x51f   :  { %5799 = vmatprep.subr.mxu0 %v6130_v0  ;;  %5784 = vmatpush3.msra.mxu1 %v6676_v12 }
 0x520   :  { %5785 = vmatprep.subr.mxu1 %v6130_v0  ;;  %5791 = vmatprep.mubr.msk.f32.mxu1 %vm6131_vm1, %v6130_v0 }
 0x521   :  { %5786 = vmatpush3.msra.mxu1 %v6682_v9  ;;  %5797 = vmatmul.mubr.msk.f32.vlgmr.msra.gmra.mxu0 %vm161_vm4, %v6824_v15 }
 0x522   :  { %5787 = vmatprep.subr.mxu1 %v6130_v0  ;;  %5800 = vmatpush3.msra.mxu0 %v6699_v17 }
 0x523   :  { %5788 = vmatpush3.msra.mxu1 %v6686_v13  ;;  %5807 = vmatprep.mubr.msk.f32.mxu0 %vm6131_vm1, %v6130_v0 }
 0x524   :  { %5789 = vmatprep.subr.mxu1 %v6130_v0  ;;  %5801 = vmatprep.subr.mxu0 %v6130_v0 }
 0x525   :  { %5790 = vmatpush3.msra.mxu1 %v6817_v37  ;;  %5802 = vmatpush3.msra.mxu0 %v6705_v7 }
 0x526   :  { %5810 = vmatprep.subr.mxu1 %v6130_v0  ;;  %5803 = vmatprep.subr.mxu0 %v6130_v0 }
 0x527   :  { %5804 = vmatpush3.msra.mxu0 %v6709_v18 }
 0x528   :  { %5805 = vmatprep.subr.mxu0 %v6130_v0 }
 0x529   :  { %5806 = vmatpush3.msra.mxu0 %v6836_v16 }
 0x52a   :  { %5826 = vmatprep.subr.mxu0 %v6130_v0 }
 0x5cd   :  { %v3175_v19 = vpop.f32.mrf.mxu1  ;;  %v3319_v20 = vpop.f32.mrf.mxu0 }
 0x5ce   :  { %v3249_v21 = vadd.f32 %v3248_v38, %v3175_v19 }
 0x5cf   :  { %v5729_v22 = vpop.f32.mrf.mxu1  ;;  %v5745_v31 = vpop.f32.mrf.mxu0 }
 0x5d0   :  { %v3252_v30 = vadd.f32 %v6843_v39, %v3249_v21 }
 0x5d1   :  { %v3389_v36 = vpop.f32.mrf.mxu1  ;;  %v3530_v1 = vpop.f32.mrf.mxu0 }
 0x5d2   :  { %v5131_v2 = vmul.f32 -1.442695, %v3252_v30  ;;  %v3390_v4 = vadd.f32 %v3389_v36, %v3319_v20 }
 0x5d3   :  { %v5750_v3 = vpop.f32.mrf.mxu1  ;;  %v5766_v40 = vpop.f32.mrf.mxu0 }
 0x5d4   :  { %6011 = vpow2.f32 %v5131_v2  ;;  %v3393_v10 = vadd.f32 %v6849_v41, %v3390_v4 }
 0x5d6   :  { %v5132_v42 = vmul.f32 -1.442695, %v3393_v10 }
 0x5d8   :  { %6013 = vpow2.f32 %v5132_v42 }
 0x5da   :  { %v3460_v43 = vpop.f32.mrf.mxu1  ;;  %v3601_v44 = vpop.f32.mrf.mxu0 }
 0x5db   :  { %v3531_v48 = vadd.f32 %v3530_v1, %v3460_v43 }
 0x5dc   :  { %v5761_v5 = vpop.f32.mrf.mxu1  ;;  %v5777_v45 = vpop.f32.mrf.mxu0 }
 0x5dd   :  { %v3534_v54 = vadd.f32 %v6861_v33, %v3531_v48 }
 0x5de   :  { %v3671_v47 = vpop.f32.mrf.mxu1 }
 0x5df   :  { %v3672_v27 = vadd.f32 %v3671_v47, %v3601_v44 }
 0x5e0   :  { %v5782_v6 = vpop.f32.mrf.mxu1 }
 0x5e1   :  { %v6012_v49 = vpop.eup %6011  ;;  %v3675_v52 = vadd.f32 %v6855_v50, %v3672_v27 }
 0x5e2   :  { %v3679_v53 = vadd.f32 1.0, %v6012_v49 }
 0x5e3   :  { %v5133_v55 = vmul.f32 -1.442695, %v3675_v52 }
 0x5e5   :  { %v6014_v56 = vpop.eup %6013  ;;  %6015 = vpow2.f32 %v5133_v55 }
 0x5e6   :  { %6017 = vrcp.f32 %v3679_v53  ;;  %v3685_v57 = vadd.f32 1.0, %v6014_v56 }
 0x5e7   :  { %6019 = vtanh.f32 %v3534_v54 }
 0x5e8   :  { %6021 = vrcp.f32 %v3685_v57 }
 0x5f2   :  { %v6016_v58 = vpop.eup %6015 }
 0x5f3   :  { %v6018_v59 = vpop.eup %6017  ;;  %v3692_v51 = vadd.f32 1.0, %v6016_v58 }
 0x5f4   :  { %v6020_v60 = vpop.eup %6019 }
 0x5f5   :  { %v6022_v46 = vpop.eup %6021  ;;  %v3696_v38 = vmul.f32 %v6020_v60, %v6018_v59  ;;  %6023 = vrcp.f32 %v3692_v51 }
 0x5f6   :  { %v3695_v62 = vmul.f32 %v6022_v46, %v6720_v61  ;;  %v3844_v61 = vpop.f32.mrf.mxu0 }
 0x5f8   :  { %v6865_v14 = vadd.f32 %v3696_v38, %v3695_v62 }
 0x5fa   :  { %6025 = vtanh.f32 %v6865_v14 }
 0x602   :  { %v6024_v19 = vpop.eup %6023 }
 0x607   :  { %v6026_v20 = vpop.eup %6025 }
 0x608   :  { %v3699_v21 = vmul.f32 %v6026_v20, %v6024_v19 }
 0x60a   :  { %5792 = vmatmul.mubr.msk.f32.vlgmr.msra.gmra.mxu1 %vm87_vm2, %v3699_v21  ;;  %5808 = vmatmul.mubr.msk.f32.vlgmr.msra.gmra.mxu0 %vm87_vm2, %v3699_v21 }
 0x60b   :  { %5811 = vmatpush3.msk.msra.mxu1 %vm165_vm3, %v6728_v63  ;;  %5827 = vmatpush3.msk.msra.mxu0 %vm165_vm3, %v6735_v8 }
 0x60c   :  { %5812 = vmatprep.mubr.msk.f32.mxu1 %vm6131_vm1, %v6130_v0  ;;  %5815 = vmatprep.subr.mxu1 %v6130_v0 }
 0x60d   :  { %5828 = vmatprep.mubr.msk.f32.mxu0 %vm6131_vm1, %v6130_v0  ;;  %5831 = vmatprep.subr.mxu0 %v6130_v0 }
 0x60e   :  { %5813 = vmatmul.mubr.msk.f32.vlgmr.msra.gmra.mxu1 %vm161_vm4, %v6824_v15  ;;  %5829 = vmatmul.mubr.msk.f32.vlgmr.msra.gmra.mxu0 %vm161_vm4, %v6824_v15 }
 0x60f   :  { %5816 = vmatpush3.msra.mxu1 %v6749_v11  ;;  %5832 = vmatpush3.msra.mxu0 %v6752_v24 }
 0x610   :  { %5817 = vmatprep.subr.mxu1 %v6130_v0  ;;  %5833 = vmatprep.subr.mxu0 %v6130_v0 }
 0x611   :  { %5818 = vmatpush3.msra.mxu1 %v6757_v26  ;;  %5834 = vmatpush3.msra.mxu0 %v6760_v28 }
 0x612   :  { %5819 = vmatprep.subr.mxu1 %v6130_v0  ;;  %5835 = vmatprep.subr.mxu0 %v6130_v0 }
 0x613   :  { %5820 = vmatpush3.msra.mxu1 %v6765_v29  ;;  %5836 = vmatpush3.msra.mxu0 %v6768_v23 }
 0x614   :  { %5821 = vmatprep.subr.mxu1 %v6130_v0  ;;  %5837 = vmatprep.subr.mxu0 %v6130_v0 }
 0x615   :  { %5822 = vmatpush3.msra.mxu1 %v6773_v32  ;;  %5823 = vmatprep.mubr.msk.f32.mxu1 %vm6131_vm1, %v6130_v0 }
 0x616   :  { %5838 = vmatpush3.msra.mxu0 %v6778_v34  ;;  %5839 = vmatprep.mubr.msk.f32.mxu0 %vm6131_vm1, %v6130_v0 }
 0x617   :  { %5824 = vmatmul.mubr.msk.f32.vlgmr.msra.gmra.mxu1 %vm87_vm2, %v3699_v21  ;;  %5840 = vmatmul.mubr.msk.f32.vlgmr.msra.gmra.mxu0 %vm87_vm2, %v3699_v21 }
 0x618   :  { %5842 = vmatprep.subr.mxu1 %v6130_v0  ;;  %5844 = vmatprep.mubr.msk.f32.mxu1 %vm6131_vm1, %v6130_v0 }
 0x619   :  { %5843 = vmatpush3.msk.msra.mxu1 %vm165_vm3, %v6791_v35  ;;  %5858 = vmatprep.subr.mxu0 %v6130_v0 }
 0x61a   :  { %5859 = vmatpush3.msk.msra.mxu0 %vm165_vm3, %v6799_v25  ;;  %5847 = vmatprep.subr.mxu1 %v6130_v0  ;;  %v5798_v25 = vpop.f32.mrf.mxu0 }
 0x61b   :  { %5845 = vmatmul.mubr.msk.f32.vlgmr.msra.gmra.mxu1 %vm161_vm4, %v6824_v15  ;;  %5860 = vmatprep.mubr.msk.f32.mxu0 %vm6131_vm1, %v6130_v0 }
 0x61c   :  { %5863 = vmatprep.subr.mxu0 %v6130_v0  ;;  %5848 = vmatpush3.msra.mxu1 %v6676_v12  ;;  %v6931_v12 = vld [vmem:[%s7034_s0 + $0xe] sm:$0x3] }
 0x61d   :  { %5849 = vmatprep.subr.mxu1 %v6130_v0  ;;  %5855 = vmatprep.mubr.msk.f32.mxu1 %vm6131_vm1, %v6130_v0 }
 0x61e   :  { %5850 = vmatpush3.msra.mxu1 %v6682_v9  ;;  %5861 = vmatmul.mubr.msk.f32.vlgmr.msra.gmra.mxu0 %vm161_vm4, %v6931_v12 }
 0x61f   :  { %5851 = vmatprep.subr.mxu1 %v6130_v0  ;;  %5864 = vmatpush3.msra.mxu0 %v6699_v17 }
 0x620   :  { %5852 = vmatpush3.msra.mxu1 %v6686_v13  ;;  %5871 = vmatprep.mubr.msk.f32.mxu0 %vm6131_vm1, %v6130_v0 }
 0x621   :  { %5853 = vmatprep.subr.mxu1 %v6130_v0  ;;  %5865 = vmatprep.subr.mxu0 %v6130_v0 }
 0x622   :  { %5854 = vmatpush3.msra.mxu1 %v6817_v37  ;;  %5866 = vmatpush3.msra.mxu0 %v6705_v7 }
 0x623   :  { %5874 = vmatprep.subr.mxu1 %v6130_v0  ;;  %5867 = vmatprep.subr.mxu0 %v6130_v0 }
 0x624   :  { %5868 = vmatpush3.msra.mxu0 %v6709_v18 }
 0x625   :  { %5869 = vmatprep.subr.mxu0 %v6130_v0 }
 0x626   :  { %5870 = vmatpush3.msra.mxu0 %v6836_v16 }
 0x627   :  { %5890 = vmatprep.subr.mxu0 %v6130_v0 }
 0x6ca   :  { %v3771_v9 = vpop.f32.mrf.mxu1  ;;  %v3915_v13 = vpop.f32.mrf.mxu0 }
 0x6cb   :  { %v3845_v17 = vadd.f32 %v3844_v61, %v3771_v9 }
 0x6cc   :  { %v5793_v37 = vpop.f32.mrf.mxu1  ;;  %v5809_v15 = vpop.f32.mrf.mxu0 }
 0x6cd   :  { %v3848_v22 = vadd.f32 %v6843_v39, %v3845_v17 }
 0x6ce   :  { %v3985_v31 = vpop.f32.mrf.mxu1  ;;  %v4126_v30 = vpop.f32.mrf.mxu0 }
 0x6cf   :  { %v5147_v7 = vmul.f32 -1.442695, %v3848_v22  ;;  %v3986_v36 = vadd.f32 %v3985_v31, %v3915_v13 }
 0x6d0   :  { %v5814_v1 = vpop.f32.mrf.mxu1  ;;  %v5830_v2 = vpop.f32.mrf.mxu0 }
 0x6d1   :  { %6027 = vpow2.f32 %v5147_v7  ;;  %v3989_v18 = vadd.f32 %v6849_v41, %v3986_v36 }
 0x6d3   :  { %v5148_v4 = vmul.f32 -1.442695, %v3989_v18 }
 0x6d5   :  { %6029 = vpow2.f32 %v5148_v4 }
 0x6d7   :  { %v4056_v16 = vpop.f32.mrf.mxu1  ;;  %v4197_v3 = vpop.f32.mrf.mxu0 }
 0x6d8   :  { %v4127_v43 = vadd.f32 %v4126_v30, %v4056_v16 }
 0x6d9   :  { %v5825_v40 = vpop.f32.mrf.mxu1  ;;  %v5841_v10 = vpop.f32.mrf.mxu0 }
 0x6da   :  { %v4130_v27 = vadd.f32 %v6861_v33, %v4127_v43 }
 0x6db   :  { %v4267_v42 = vpop.f32.mrf.mxu1 }
 0x6dc   :  { %v4268_v44 = vadd.f32 %v4267_v42, %v4197_v3 }
 0x6dd   :  { %v5846_v5 = vpop.f32.mrf.mxu1 }
 0x6de   :  { %v6028_v45 = vpop.eup %6027  ;;  %v4271_v47 = vadd.f32 %v6855_v50, %v4268_v44 }
 0x6df   :  { %v4275_v48 = vadd.f32 1.0, %v6028_v45 }
 0x6e0   :  { %v5149_v6 = vmul.f32 -1.442695, %v4271_v47 }
 0x6e2   :  { %v6030_v49 = vpop.eup %6029  ;;  %6031 = vpow2.f32 %v5149_v6 }
 0x6e3   :  { %6033 = vrcp.f32 %v4275_v48  ;;  %v4281_v52 = vadd.f32 1.0, %v6030_v49  ;;  %v5168_v48 = vld [vmem:[%s7040_s6] ss:$0 sm:$0xff]  ;;  %s6103_s6 = scalar_lea.vmem %s5021_s1, 32 }
 0x6e4   :  { %6035 = vtanh.f32 %v4130_v27  ;;  %v5166_v49 = vld [vmem:[%s7041_s7] ss:$0 sm:$0xff]  ;;  %p6104_p5 = scmp.ne.s32.totalorder %s5021_s1, %s6103_s6  ;;  %p6109_p7 = scmp.lt.s32.totalorder %s6103_s6, %s6103_s6 }
 0x6e5   :  { %6037 = vrcp.f32 %v4281_v52 }
 0x6e6   :  { %p6110_p8 = por %p6109_p7, %p6108_p6 }
 0x6e8   :  { %p6111_p9 = pnand %p6110_p8, %p6104_p5 }
 0x6ef   :  { %v6032_v53 = vpop.eup %6031 }
 0x6f0   :  { %v6034_v54 = vpop.eup %6033  ;;  %v4288_v57 = vadd.f32 1.0, %v6032_v53 }
 0x6f1   :  { %v6036_v55 = vpop.eup %6035 }
 0x6f2   :  { %v6038_v56 = vpop.eup %6037  ;;  %v4292_v59 = vmul.f32 %v6036_v55, %v6034_v54  ;;  %6039 = vrcp.f32 %v4288_v57 }
 0x6f3   :  { %v4291_v58 = vmul.f32 %v6038_v56, %v6865_v14 }
 0x6f5   :  { %v6950_v60 = vadd.f32 %v4292_v59, %v4291_v58 }
 0x6f7   :  { %6041 = vtanh.f32 %v6950_v60 }
 0x6ff   :  { %v6040_v46 = vpop.eup %6039 }
 0x704   :  { %v6042_v51 = vpop.eup %6041 }
 0x705   :  { %v4295_v62 = vmul.f32 %v6042_v51, %v6040_v46 }
 0x707   :  { %5856 = vmatmul.mubr.msk.f32.vlgmr.msra.gmra.mxu1 %vm87_vm2, %v4295_v62  ;;  %5872 = vmatmul.mubr.msk.f32.vlgmr.msra.gmra.mxu0 %vm87_vm2, %v4295_v62 }
 0x708   :  { %5875 = vmatpush3.msk.msra.mxu1 %vm165_vm3, %v6728_v63  ;;  %5891 = vmatpush3.msk.msra.mxu0 %vm165_vm3, %v6735_v8  ;;  %v4440_v63 = vpop.f32.mrf.mxu0 }
 0x709   :  { %5876 = vmatprep.mubr.msk.f32.mxu1 %vm6131_vm1, %v6130_v0  ;;  %5879 = vmatprep.subr.mxu1 %v6130_v0 }
 0x70a   :  { %5892 = vmatprep.mubr.msk.f32.mxu0 %vm6131_vm1, %v6130_v0  ;;  %5895 = vmatprep.subr.mxu0 %v6130_v0  ;;  %v5862_v8 = vpop.f32.mrf.mxu0 }
 0x70b   :  { %5877 = vmatmul.mubr.msk.f32.vlgmr.msra.gmra.mxu1 %vm161_vm4, %v6931_v12  ;;  %5893 = vmatmul.mubr.msk.f32.vlgmr.msra.gmra.mxu0 %vm161_vm4, %v6931_v12 }
 0x70c   :  { %5880 = vmatpush3.msra.mxu1 %v6749_v11  ;;  %5896 = vmatpush3.msra.mxu0 %v6752_v24  ;;  %v4901_v11 = vld [vmem:[%s7039_s5 + $0x18] sm:$0xff]  ;;  %v4900_v24 = vld [vmem:[%s7039_s5 + $0x10] sm:$0xff] }
 0x70d   :  { %5881 = vmatprep.subr.mxu1 %v6130_v0  ;;  %5897 = vmatprep.subr.mxu0 %v6130_v0 }
 0x70e   :  { %5882 = vmatpush3.msra.mxu1 %v6757_v26  ;;  %5898 = vmatpush3.msra.mxu0 %v6760_v28  ;;  %v4899_v26 = vld [vmem:[%s7039_s5 + $0x8] sm:$0xff]  ;;  %v4898_v28 = vld [vmem:[%s7039_s5] sm:$0xff] }
 0x70f   :  { %5883 = vmatprep.subr.mxu1 %v6130_v0  ;;  %5899 = vmatprep.subr.mxu0 %v6130_v0 }
 0x710   :  { %5884 = vmatpush3.msra.mxu1 %v6765_v29  ;;  %5900 = vmatpush3.msra.mxu0 %v6768_v23  ;;  %v4982_v29 = vld [vmem:[%s7038_s4] sm:$0x3]  ;;  %v6132_v23 = vmov 0  }
 0x711   :  { %5885 = vmatprep.subr.mxu1 %v6130_v0  ;;  %5901 = vmatprep.subr.mxu0 %v6130_v0 }
 0x712   :  { %5886 = vmatpush3.msra.mxu1 %v6773_v32  ;;  %5887 = vmatprep.mubr.msk.f32.mxu1 %vm6131_vm1, %v6130_v0 }
 0x713   :  { %5902 = vmatpush3.msra.mxu0 %v6778_v34  ;;  %5903 = vmatprep.mubr.msk.f32.mxu0 %vm6131_vm1, %v6130_v0 }
 0x714   :  { %5888 = vmatmul.mubr.msk.f32.vlgmr.msra.gmra.mxu1 %vm87_vm2, %v4295_v62  ;;  %5904 = vmatmul.mubr.msk.f32.vlgmr.msra.gmra.mxu0 %vm87_vm2, %v4295_v62 }
 0x715   :  { %5906 = vmatprep.subr.mxu1 %v6130_v0  ;;  %5908 = vmatprep.mubr.msk.f32.mxu1 %vm6131_vm1, %v6130_v0 }
 0x716   :  { %5907 = vmatpush3.msk.msra.mxu1 %vm165_vm3, %v6791_v35  ;;  %5930 = vset.pattern.permute.xlu0 %v6132_v23 }
 0x717   :  { %5911 = vmatprep.subr.mxu1 %v6130_v0  ;;  %4986 = vperm.xlu0 %5930, %v4982_v29  }
 0x718   :  { %5909 = vmatmul.mubr.msk.f32.vlgmr.msra.gmra.mxu1 %vm161_vm4, %v6931_v12 }
 0x719   :  { %5919 = vmatprep.mubr.msk.f32.mxu1 %vm6131_vm1, %v6130_v0  ;;  %5912 = vmatpush3.msra.mxu1 %v4901_v11 }
 0x71a   :  { %5913 = vmatprep.subr.mxu1 %v6130_v0 }
 0x71b   :  { %5914 = vmatpush3.msra.mxu1 %v4900_v24 }
 0x71c   :  { %5915 = vmatprep.subr.mxu1 %v6130_v0 }
 0x71d   :  { %5916 = vmatpush3.msra.mxu1 %v4899_v26 }
 0x71e   :  { %5917 = vmatprep.subr.mxu1 %v6130_v0 }
 0x71f   :  { %5918 = vmatpush3.msra.mxu1 %v4898_v28 }
 0x792   :  { %v4987_v27 = vpop.permute.xlu0 %4986 }
 0x793   :  { %v4995_v6 = vmul.f32 %v5168_v48, %v4987_v27 }
 0x795   :  { %v5006_v52 = vsub.f32 %v5168_v48, %v4995_v6 }
 0x7c7   :  { %v4367_v32 = vpop.f32.mrf.mxu1  ;;  %v4511_v34 = vpop.f32.mrf.mxu0 }
 0x7c8   :  { %v4441_v35 = vadd.f32 %v4440_v63, %v4367_v32 }
 0x7c9   :  { %v5857_v38 = vpop.f32.mrf.mxu1  ;;  %v5873_v14 = vpop.f32.mrf.mxu0 }
 0x7ca   :  { %v4444_v19 = vadd.f32 %v6843_v39, %v4441_v35 }
 0x7cb   :  { %v4581_v20 = vpop.f32.mrf.mxu1  ;;  %v4722_v21 = vpop.f32.mrf.mxu0 }
 0x7cc   :  { %v5163_v61 = vmul.f32 -1.442695, %v4444_v19  ;;  %v4582_v25 = vadd.f32 %v4581_v20, %v4511_v34 }
 0x7cd   :  { %v5878_v0 = vpop.f32.mrf.mxu1  ;;  %v5894_v12 = vpop.f32.mrf.mxu0 }
 0x7ce   :  { %6043 = vpow2.f32 %v5163_v61  ;;  %v4585_v9 = vadd.f32 %v6849_v41, %v4582_v25 }
 0x7d0   :  { %v5164_v13 = vmul.f32 -1.442695, %v4585_v9 }
 0x7d2   :  { %6045 = vpow2.f32 %v5164_v13 }
 0x7d4   :  { %v4652_v17 = vpop.f32.mrf.mxu1  ;;  %v4793_v37 = vpop.f32.mrf.mxu0 }
 0x7d5   :  { %v4723_v30 = vadd.f32 %v4722_v21, %v4652_v17 }
 0x7d6   :  { %v5889_v15 = vpop.f32.mrf.mxu1  ;;  %v5905_v22 = vpop.f32.mrf.mxu0 }
 0x7d7   :  { %v4726_v18 = vadd.f32 %v6861_v33, %v4723_v30 }
 0x7d8   :  { %v4863_v31 = vpop.f32.mrf.mxu1 }
 0x7d9   :  { %v4864_v7 = vadd.f32 %v4863_v31, %v4793_v37 }
 0x7da   :  { %v5910_v36 = vpop.f32.mrf.mxu1 }
 0x7db   :  { %v6044_v39 = vpop.eup %6043  ;;  %v4867_v1 = vadd.f32 %v6855_v50, %v4864_v7 }
 0x7dc   :  { %v4871_v2 = vadd.f32 1.0, %v6044_v39 }
 0x7dd   :  { %v5165_v4 = vmul.f32 -1.442695, %v4867_v1 }
 0x7df   :  { %v6046_v16 = vpop.eup %6045  ;;  %6047 = vpow2.f32 %v5165_v4 }
 0x7e0   :  { %6049 = vrcp.f32 %v4871_v2  ;;  %v4877_v41 = vadd.f32 1.0, %v6046_v16 }
 0x7e1   :  { %6051 = vtanh.f32 %v4726_v18 }
 0x7e2   :  { %6053 = vrcp.f32 %v4877_v41 }
 0x7ec   :  { %v6048_v3 = vpop.eup %6047 }
 0x7ed   :  { %v6050_v40 = vpop.eup %6049  ;;  %v4884_v43 = vadd.f32 1.0, %v6048_v3 }
 0x7ee   :  { %v6052_v10 = vpop.eup %6051 }
 0x7ef   :  { %v6054_v42 = vpop.eup %6053  ;;  %v4888_v5 = vmul.f32 %v6052_v10, %v6050_v40  ;;  %6055 = vrcp.f32 %v4884_v43 }
 0x7f0   :  { %v4887_v44 = vmul.f32 %v6054_v42, %v6950_v60 }
 0x7f2   :  { %v4889_v45 = vadd.f32 %v4888_v5, %v4887_v44 }
 0x7f4   :  { %6057 = vtanh.f32 %v4889_v45  ;;  %4894 = vst.msk [vmem:[#allocation3] sm:$0x3] %vm48_vm0, %v4889_v45 }
 0x7fc   :  { %v6056_v50 = vpop.eup %6055 }
 0x801   :  { %v6058_v33 = vpop.eup %6057 }
 0x802   :  { %v4891_v47 = vmul.f32 %v6058_v33, %v6056_v50 }
 0x804   :  { %4893 = vst.msk [vmem:[#allocation2] sm:$0x3] %vm48_vm0, %v4891_v47  ;;  %5920 = vmatmul.mubr.msk.f32.vlgmr.msra.gmra.mxu1 %vm87_vm2, %v4891_v47 }
 0x8c4   :  { %v4978_v53 = vpop.f32.mrf.mxu1 }
 0x8c5   :  { %v4979_v54 = vadd.f32 %v5166_v49, %v4978_v53 }
 0x8c6   :  { %v5921_v55 = vpop.f32.mrf.mxu1 }
 0x8c7   :  { %v4996_v56 = vadd.f32 %v4995_v6, %v4979_v54  ;;  %v5007_v57 = vadd.f32 %v5006_v52, %v4979_v54 }
 0x8c9   :  { %5009 = vrot.lane.b32.xlu0 %v5007_v57, %s6133_s22  ;;  %4998 = vst.msk [vmem:[#allocation7] sm:$0x3] %vm4997_vm5, %v4996_v56 }
 0x93b   :  { %v5010_v58 = vpop.permute.xlu0 %5009 }
 0x93c   :  { %5013 = vst.msk [vmem:[#allocation7] sm:$0x3] %vm5012_vm6, %v5010_v58 }
 0x93d   :  { %6114 = shalt.err (!%p6111_p9)
}
 0x93e   :  { %5023 = dma.vmem_to_hbm [thread:$0]  %s5021_s1, 32, %s7042_s8, [#allocation6]  }
 0x93f   :  { %6125 = dma.done.wait [#allocation6], 32  }
 0x940   :  { %6126 = vsyncadd [#allocation6], 4294967264 }
 0x941   :  { %5027 = vsyncpa [#allocation5], 1 }
 0x942   :  { %5028 = vsyncpa [#allocation6], 1 }

</bundles_post_ra>
